<compile_context>
chip_gen: v7x
topology: tpu7x:2x2x1
jax: 0.10.0
libtpu: 0.0.40
codegen_flags: <defaults>
</compile_context>

<pallas_src>
import jax
import jax.numpy as jnp
from jax.experimental import pallas as pl
from jax.experimental.pallas import tpu as pltpu

INPUT_DIM = 5
HIDDEN = [512, 256, 128, 64]
LANE = 128            # input features padded to one full lane width
MAX_BATCH_TILE = 512  # upper bound on rows per grid step


def _round_up(n, m):
    return -(-n // m) * m


def _mlp_kernel(x_ref,
                w1_ref, b1_ref,
                w2_ref, b2_ref,
                w3_ref, b3_ref,
                w4_ref, b4_ref,
                o_ref):
    """One batch tile: 4 chained (matmul + bias + ReLU) stages, all in VMEM.

    Matmul operands are in the weights' dtype (bf16 by default -> native MXU
    rate); accumulation, bias add and ReLU stay in f32.
    """
    layers = ((w1_ref, b1_ref), (w2_ref, b2_ref), (w3_ref, b3_ref), (w4_ref, b4_ref))
    h = x_ref[...]
    acc = None
    for li, (w_ref, b_ref) in enumerate(layers):
        acc = jnp.dot(h, w_ref[...], preferred_element_type=jnp.float32)
        acc = jnp.maximum(acc + b_ref[...], 0.0)
        if li < len(layers) - 1:
            h = acc.astype(w_ref.dtype)
    o_ref[...] = acc.astype(o_ref.dtype)


def feature_extractor(x, params, *, max_batch_tile=MAX_BATCH_TILE,
                      compute_dtype=jnp.bfloat16):
    """x: (B, INPUT_DIM) float32. params: list of (W, b), W:(in,out), b:(1,out), f32."""
    B, D = x.shape
    assert D == INPUT_DIM
    (w1, b1), (w2, b2), (w3, b3), (w4, b4) = params
    out_dim = w4.shape[1]

    # Adaptive tiling: as few grid steps as possible without over-padding
    # small batches.  Tile rows are a multiple of 16 (bf16 sublane packing).
    n_tiles = max(1, -(-B // max_batch_tile))
    batch_tile = _round_up(-(-B // n_tiles), 16)
    Bp = n_tiles * batch_tile

    # Lane-dense input: zero-pad features 5 -> 128 and zero-pad w1 rows to
    # match (padded columns multiply zero weights, so the result is unchanged).
    # Ragged batch rows are zero-padded too and sliced off before returning.
    x_p = jnp.pad(x, ((0, Bp - B), (0, LANE - D)))
    w1_p = jnp.pad(w1, ((0, LANE - D), (0, 0)))

    # Matmul operands in compute dtype (bf16 default); biases stay f32.
    x_c = x_p.astype(compute_dtype)
    w1_c, w2_c, w3_c, w4_c = (w.astype(compute_dtype) for w in (w1_p, w2, w3, w4))
    b1, b2, b3, b4 = (b.astype(jnp.float32) for b in (b1, b2, b3, b4))

    def resident(shape):
        # Same full block every grid step -> loaded once, stays resident in VMEM.
        return pl.BlockSpec(shape, lambda i: (0, 0))

    dims = [LANE] + HIDDEN
    flops = int(2 * Bp * sum(a * b for a, b in zip(dims[:-1], dims[1:])))
    bytes_accessed = int(
        x_c.size * x_c.dtype.itemsize
        + sum(int(a.size) * a.dtype.itemsize
              for a in (w1_c, w2_c, w3_c, w4_c, b1, b2, b3, b4))
        + Bp * out_dim * 4
    )

    out = pl.pallas_call(
        _mlp_kernel,
        out_shape=jax.ShapeDtypeStruct((Bp, out_dim), jnp.float32),
        grid_spec=pltpu.PrefetchScalarGridSpec(
            num_scalar_prefetch=0,
            grid=(n_tiles,),
            in_specs=[
                pl.BlockSpec((batch_tile, LANE), lambda i: (i, 0)),
                resident(w1_c.shape), resident(b1.shape),
                resident(w2_c.shape), resident(b2.shape),
                resident(w3_c.shape), resident(b3.shape),
                resident(w4_c.shape), resident(b4.shape),
            ],
            out_specs=pl.BlockSpec((batch_tile, out_dim), lambda i: (i, 0)),
        ),
        compiler_params=pltpu.CompilerParams(
            dimension_semantics=("parallel",),
        ),
        cost_estimate=pl.CostEstimate(
            flops=flops, transcendentals=0, bytes_accessed=bytes_accessed),
    )(x_c, w1_c, b1, w2_c, b2, w3_c, b3, w4_c, b4)

    return out[:B] if Bp != B else out


def init_params(key):
    """Deterministic init mimicking nn.Linear's uniform(-1/sqrt(fan_in), 1/sqrt(fan_in))."""
    params = []
    dims = [INPUT_DIM] + HIDDEN
    for din, dout in zip(dims[:-1], dims[1:]):
        kw, kb, key = jax.random.split(key, 3)
        bound = 1.0 / jnp.sqrt(jnp.float32(din))
        w = jax.random.uniform(kw, (din, dout), jnp.float32, -bound, bound)
        b = jax.random.uniform(kb, (1, dout), jnp.float32, -bound, bound)
        params.append((w, b))
    return params


def reference_forward(x, params, compute_dtype=jnp.float32):
    """Pure-JAX reference mirroring the kernel numerics (dot in compute_dtype, f32 accumulate)."""
    h = x.astype(compute_dtype)
    n = len(params)
    for i, (w, b) in enumerate(params):
        acc = jnp.dot(h, w.astype(compute_dtype), preferred_element_type=jnp.float32)
        acc = jnp.maximum(acc + b, 0.0)
        h = acc if i == n - 1 else acc.astype(compute_dtype)
    return h


if __name__ == "__main__":
    key = jax.random.PRNGKey(0)
    kx, kp = jax.random.split(key)

    batch = 100  # deliberately not a tile multiple: exercises the pad/slice path
    x = jax.random.normal(kx, (batch, INPUT_DIM), jnp.float32)
    params = init_params(kp)

    # Default path: bf16 matmul inputs, f32 accumulation.
    out_bf16 = jax.block_until_ready(feature_extractor(x, params))
    ref_bf16 = reference_forward(x, params, compute_dtype=jnp.bfloat16)
    assert out_bf16.shape == (batch, HIDDEN[-1]), out_bf16.shape
    assert jnp.allclose(out_bf16, ref_bf16, atol=1e-2, rtol=1e-2), \
        "bf16 path mismatch vs JAX reference"

    # Full-f32 path: tighter structural check of the kernel itself.
    out_f32 = jax.block_until_ready(
        feature_extractor(x, params, compute_dtype=jnp.float32))
    ref_f32 = reference_forward(x, params, compute_dtype=jnp.float32)
    assert jnp.allclose(out_f32, ref_f32, atol=1e-4, rtol=1e-4), \
        "f32 path mismatch vs JAX reference"

    # Multi-tile path (forces grid > 1 and the megacore-parallel axis).
    big = 1200
    xb = jax.random.normal(kx, (big, INPUT_DIM), jnp.float32)
    out_big = jax.block_until_ready(feature_extractor(xb, params))
    ref_big = reference_forward(xb, params, compute_dtype=jnp.bfloat16)
    assert out_big.shape == (big, HIDDEN[-1]), out_big.shape
    assert jnp.allclose(out_big, ref_big, atol=1e-2, rtol=1e-2), \
        "multi-tile path mismatch vs JAX reference"

    print("KERNEL_OK")
</pallas_src>

<mosaic_0001>
module attributes {stable_mosaic.version = 11 : i64} {
  func.func @_mlp_kernel(%arg0: i32, %arg1: memref<112x128xbf16, #tpu.memory_space<vmem>>, %arg2: memref<128x512xbf16, #tpu.memory_space<vmem>>, %arg3: memref<1x512xf32, #tpu.memory_space<vmem>>, %arg4: memref<512x256xbf16, #tpu.memory_space<vmem>>, %arg5: memref<1x256xf32, #tpu.memory_space<vmem>>, %arg6: memref<256x128xbf16, #tpu.memory_space<vmem>>, %arg7: memref<1x128xf32, #tpu.memory_space<vmem>>, %arg8: memref<128x64xbf16, #tpu.memory_space<vmem>>, %arg9: memref<1x64xf32, #tpu.memory_space<vmem>>, %arg10: memref<112x64xf32, #tpu.memory_space<vmem>>) attributes {dimension_semantics = [#tpu.dimension_semantics<parallel>], iteration_bounds = array<i64: 1>, scalar_prefetch = 0 : i64, scratch_operands = 0 : i64, tpu.core_type = #tpu.core_type<tc>, window_params = [{transform_indices = @transform_0, window_bounds = array<i64: 112, 128>}, {pipeline_mode = #tpu.pipeline_mode<synchronous>, transform_indices = @transform_1, window_bounds = array<i64: 128, 512>}, {pipeline_mode = #tpu.pipeline_mode<synchronous>, transform_indices = @transform_2, window_bounds = array<i64: 1, 512>}, {pipeline_mode = #tpu.pipeline_mode<synchronous>, transform_indices = @transform_3, window_bounds = array<i64: 512, 256>}, {pipeline_mode = #tpu.pipeline_mode<synchronous>, transform_indices = @transform_4, window_bounds = array<i64: 1, 256>}, {pipeline_mode = #tpu.pipeline_mode<synchronous>, transform_indices = @transform_5, window_bounds = array<i64: 256, 128>}, {pipeline_mode = #tpu.pipeline_mode<synchronous>, transform_indices = @transform_6, window_bounds = array<i64: 1, 128>}, {pipeline_mode = #tpu.pipeline_mode<synchronous>, transform_indices = @transform_7, window_bounds = array<i64: 128, 64>}, {pipeline_mode = #tpu.pipeline_mode<synchronous>, transform_indices = @transform_8, window_bounds = array<i64: 1, 64>}, {transform_indices = @transform_9, window_bounds = array<i64: 112, 64>}]} {
    %c0 = arith.constant 0 : index
    %c0_0 = arith.constant 0 : index
    %0 = vector.load %arg1[%c0, %c0_0] : memref<112x128xbf16, #tpu.memory_space<vmem>>, vector<112x128xbf16>
    %c0_1 = arith.constant 0 : index
    %c0_2 = arith.constant 0 : index
    %1 = vector.load %arg2[%c0_1, %c0_2] : memref<128x512xbf16, #tpu.memory_space<vmem>>, vector<128x512xbf16>
    %cst = arith.constant dense<0.000000e+00> : vector<112x512xf32>
    %2 = tpu.matmul %0, %1, %cst {dimension_numbers = #tpu.dot_dimension_numbers<[1], [0], [0], [1], [0, 0, 1, 1], [], []>} : vector<112x128xbf16>, vector<128x512xbf16>, vector<112x512xf32> -> vector<112x512xf32>
    %c0_3 = arith.constant 0 : index
    %c0_4 = arith.constant 0 : index
    %3 = vector.load %arg3[%c0_3, %c0_4] : memref<1x512xf32, #tpu.memory_space<vmem>>, vector<1x512xf32>
    %4 = vector.broadcast %3 : vector<1x512xf32> to vector<112x512xf32>
    %5 = arith.addf %2, %4 : vector<112x512xf32>
    %cst_5 = arith.constant 0.000000e+00 : f32
    %6 = vector.broadcast %cst_5 : f32 to vector<112x512xf32>
    %7 = arith.maximumf %5, %6 : vector<112x512xf32>
    %8 = arith.truncf %7 : vector<112x512xf32> to vector<112x512xbf16>
    %c0_6 = arith.constant 0 : index
    %c0_7 = arith.constant 0 : index
    %9 = vector.load %arg4[%c0_6, %c0_7] : memref<512x256xbf16, #tpu.memory_space<vmem>>, vector<512x256xbf16>
    %cst_8 = arith.constant dense<0.000000e+00> : vector<112x256xf32>
    %10 = tpu.matmul %8, %9, %cst_8 {dimension_numbers = #tpu.dot_dimension_numbers<[1], [0], [0], [1], [0, 0, 1, 1], [], []>} : vector<112x512xbf16>, vector<512x256xbf16>, vector<112x256xf32> -> vector<112x256xf32>
    %c0_9 = arith.constant 0 : index
    %c0_10 = arith.constant 0 : index
    %11 = vector.load %arg5[%c0_9, %c0_10] : memref<1x256xf32, #tpu.memory_space<vmem>>, vector<1x256xf32>
    %12 = vector.broadcast %11 : vector<1x256xf32> to vector<112x256xf32>
    %13 = arith.addf %10, %12 : vector<112x256xf32>
    %cst_11 = arith.constant 0.000000e+00 : f32
    %14 = vector.broadcast %cst_11 : f32 to vector<112x256xf32>
    %15 = arith.maximumf %13, %14 : vector<112x256xf32>
    %16 = arith.truncf %15 : vector<112x256xf32> to vector<112x256xbf16>
    %c0_12 = arith.constant 0 : index
    %c0_13 = arith.constant 0 : index
    %17 = vector.load %arg6[%c0_12, %c0_13] : memref<256x128xbf16, #tpu.memory_space<vmem>>, vector<256x128xbf16>
    %cst_14 = arith.constant dense<0.000000e+00> : vector<112x128xf32>
    %18 = tpu.matmul %16, %17, %cst_14 {dimension_numbers = #tpu.dot_dimension_numbers<[1], [0], [0], [1], [0, 0, 1, 1], [], []>} : vector<112x256xbf16>, vector<256x128xbf16>, vector<112x128xf32> -> vector<112x128xf32>
    %c0_15 = arith.constant 0 : index
    %c0_16 = arith.constant 0 : index
    %19 = vector.load %arg7[%c0_15, %c0_16] : memref<1x128xf32, #tpu.memory_space<vmem>>, vector<1x128xf32>
    %20 = vector.broadcast %19 : vector<1x128xf32> to vector<112x128xf32>
    %21 = arith.addf %18, %20 : vector<112x128xf32>
    %cst_17 = arith.constant 0.000000e+00 : f32
    %22 = vector.broadcast %cst_17 : f32 to vector<112x128xf32>
    %23 = arith.maximumf %21, %22 : vector<112x128xf32>
    %24 = arith.truncf %23 : vector<112x128xf32> to vector<112x128xbf16>
    %c0_18 = arith.constant 0 : index
    %c0_19 = arith.constant 0 : index
    %25 = vector.load %arg8[%c0_18, %c0_19] : memref<128x64xbf16, #tpu.memory_space<vmem>>, vector<128x64xbf16>
    %cst_20 = arith.constant dense<0.000000e+00> : vector<112x64xf32>
    %26 = tpu.matmul %24, %25, %cst_20 {dimension_numbers = #tpu.dot_dimension_numbers<[1], [0], [0], [1], [0, 0, 1, 1], [], []>} : vector<112x128xbf16>, vector<128x64xbf16>, vector<112x64xf32> -> vector<112x64xf32>
    %c0_21 = arith.constant 0 : index
    %c0_22 = arith.constant 0 : index
    %27 = vector.load %arg9[%c0_21, %c0_22] : memref<1x64xf32, #tpu.memory_space<vmem>>, vector<1x64xf32>
    %28 = vector.broadcast %27 : vector<1x64xf32> to vector<112x64xf32>
    %29 = arith.addf %26, %28 : vector<112x64xf32>
    %cst_23 = arith.constant 0.000000e+00 : f32
    %30 = vector.broadcast %cst_23 : f32 to vector<112x64xf32>
    %31 = arith.maximumf %29, %30 : vector<112x64xf32>
    %c0_24 = arith.constant 0 : index
    %c0_25 = arith.constant 0 : index
    %32 = vector.load %arg10[%c0_24, %c0_25] : memref<112x64xf32, #tpu.memory_space<vmem>>, vector<112x64xf32>
    tpu.vector_store %arg10[%c0_24, %c0_25], %31 {strides = array<i32>} : memref<112x64xf32, #tpu.memory_space<vmem>>, vector<112x64xf32>,
    return
  }
  func.func @transform_0(%arg0: i32) -> (i32, i32) {
    %c0_i32 = arith.constant 0 : i32
    %c0_i32_0 = arith.constant 0 : i32
    return %arg0, %c0_i32 : i32, i32
  }
  func.func @transform_1(%arg0: i32) -> (i32, i32) {
    %c0_i32 = arith.constant 0 : i32
    %c0_i32_0 = arith.constant 0 : i32
    %c0_i32_1 = arith.constant 0 : i32
    return %c0_i32, %c0_i32_0 : i32, i32
  }
  func.func @transform_2(%arg0: i32) -> (i32, i32) {
    %c0_i32 = arith.constant 0 : i32
    %c0_i32_0 = arith.constant 0 : i32
    %c0_i32_1 = arith.constant 0 : i32
    return %c0_i32, %c0_i32_0 : i32, i32
  }
  func.func @transform_3(%arg0: i32) -> (i32, i32) {
    %c0_i32 = arith.constant 0 : i32
    %c0_i32_0 = arith.constant 0 : i32
    %c0_i32_1 = arith.constant 0 : i32
    return %c0_i32, %c0_i32_0 : i32, i32
  }
  func.func @transform_4(%arg0: i32) -> (i32, i32) {
    %c0_i32 = arith.constant 0 : i32
    %c0_i32_0 = arith.constant 0 : i32
    %c0_i32_1 = arith.constant 0 : i32
    return %c0_i32, %c0_i32_0 : i32, i32
  }
  func.func @transform_5(%arg0: i32) -> (i32, i32) {
    %c0_i32 = arith.constant 0 : i32
    %c0_i32_0 = arith.constant 0 : i32
    %c0_i32_1 = arith.constant 0 : i32
    return %c0_i32, %c0_i32_0 : i32, i32
  }
  func.func @transform_6(%arg0: i32) -> (i32, i32) {
    %c0_i32 = arith.constant 0 : i32
    %c0_i32_0 = arith.constant 0 : i32
    %c0_i32_1 = arith.constant 0 : i32
    return %c0_i32, %c0_i32_0 : i32, i32
  }
  func.func @transform_7(%arg0: i32) -> (i32, i32) {
    %c0_i32 = arith.constant 0 : i32
    %c0_i32_0 = arith.constant 0 : i32
    %c0_i32_1 = arith.constant 0 : i32
    return %c0_i32, %c0_i32_0 : i32, i32
  }
  func.func @transform_8(%arg0: i32) -> (i32, i32) {
    %c0_i32 = arith.constant 0 : i32
    %c0_i32_0 = arith.constant 0 : i32
    %c0_i32_1 = arith.constant 0 : i32
    return %c0_i32, %c0_i32_0 : i32, i32
  }
  func.func @transform_9(%arg0: i32) -> (i32, i32) {
    %c0_i32 = arith.constant 0 : i32
    %c0_i32_0 = arith.constant 0 : i32
    return %arg0, %c0_i32 : i32, i32
  }
}

</mosaic_0001>

<bundles_post_ra>
// kernel: tpu_custom_call.1
= control target key start
LH: loop header
LB: loop body
LE: loop exit
PB: predicated region body
PF: predicated region fallthrough
CT: control target
= control target key end

     0   :  { %14 = vsyncpa [#allocation3], 0  ;;  %s2690_s0 = inlined_call_operand.vmem [shape: bf16[112,128], index: 0, kind: input, shape index: {}]   ;;  %s2691_s1 = inlined_call_operand.hbm [shape: bf16[128,512], index: 1, kind: input, shape index: {}]   ;;  %s2692_s2 = inlined_call_operand.vmem [shape: f32[1,512], index: 2, kind: input, shape index: {}]   ;;  %s2693_s3 = inlined_call_operand.hbm [shape: bf16[512,256], index: 3, kind: input, shape index: {}]   ;;  %s2694_s4 = inlined_call_operand.vmem [shape: f32[1,256], index: 4, kind: input, shape index: {}]   ;;  %s2695_s5 = inlined_call_operand.hbm [shape: bf16[256,128], index: 5, kind: input, shape index: {}]   ;;  %s2696_s6 = inlined_call_operand.vmem [shape: f32[1,128], index: 6, kind: input, shape index: {}]   ;;  %s2697_s7 = inlined_call_operand.vmem [shape: bf16[128,64], index: 7, kind: input, shape index: {}]   ;;  %s2698_s8 = inlined_call_operand.vmem [shape: f32[1,64], index: 8, kind: input, shape index: {}]   ;;  %s2699_s9 = inlined_call_operand.vmem [shape: f32[112,64], index: 9, kind: output, shape index: {}]  }
   0x1   :  { %15 = vsyncpa [#allocation5], 0  ;;  %s2277_s30 = smov [#allocation4]   ;;  %s2207_s13 = scalar_lea.hbm %s2693_s3, 8192 }
   0x2   :  { %s37_s10 = sshll.u32 %s2277_s30, 4  ;;  %p2208_p0 = scmp.ne.s32.totalorder %s2693_s3, %s2207_s13  ;;  %s38_s10 = int_to_ptr.vmem [resolvable:$true] %s37_s10 }
   0x3   :  { %p2211_p1 = scmp.lt.u32.totalorder %s2207_s13, %s2693_s3 }
   0x5   :  { %p2213_p2 = pnand %p2211_p1, %p2208_p0 }
   0x7   :  { %2216 = shalt.err (!%p2213_p2)
}
   0x8   :  { %s2217_s18 = scalar_lea.vmem %s38_s10, 8192  ;;  %p2222_p4 = scmp.lt.s32.totalorder %s38_s10, %s38_s10 }
   0x9   :  { %p2218_p3 = scmp.ne.s32.totalorder %s38_s10, %s2217_s18  ;;  %p2223_p5 = scmp.lt.s32.totalorder %s2217_s18, %s2217_s18 }
   0xb   :  { %p2224_p6 = por %p2223_p5, %p2222_p4 }
   0xd   :  { %p2225_p7 = pnand %p2224_p6, %p2218_p3 }
   0xf   :  { %2228 = shalt.err (!%p2225_p7)
}
  0x10   :  { %s2278_s19 = smov 128   ;;  %s2279_s20 = smov 8  }
  0x11   :  { %43 = dma.hbm_to_vmem [thread:$0]  %s2693_s3, 8192, %s38_s10, [#allocation5], %s2278_s19, %s2278_s19, %s2279_s20  }
  0x12   :  { %s2280_s23 = smov [#allocation2]   ;;  %s2229_s27 = scalar_lea.hbm %s2691_s1, 4096 }
  0x13   :  { %s23_s24 = sshll.u32 %s2280_s23, 4  ;;  %p2230_p8 = scmp.ne.s32.totalorder %s2691_s1, %s2229_s27  ;;  %s24_s24 = int_to_ptr.vmem [resolvable:$true] %s23_s24 }
  0x14   :  { %p2233_p9 = scmp.lt.u32.totalorder %s2229_s27, %s2691_s1 }
  0x16   :  { %p2235_p10 = pnand %p2233_p9, %p2230_p8 }
  0x18   :  { %2238 = shalt.err (!%p2235_p10)
}
  0x19   :  { %s2239_s12 = scalar_lea.vmem %s24_s24, 4096  ;;  %p2244_p12 = scmp.lt.s32.totalorder %s24_s24, %s24_s24 }
  0x1a   :  { %p2240_p11 = scmp.ne.s32.totalorder %s24_s24, %s2239_s12  ;;  %p2245_p13 = scmp.lt.s32.totalorder %s2239_s12, %s2239_s12 }
  0x1c   :  { %p2246_p0 = por %p2245_p13, %p2244_p12 }
  0x1e   :  { %p2247_p1 = pnand %p2246_p0, %p2240_p11 }
  0x20   :  { %2250 = shalt.err (!%p2247_p1)
}
  0x21   :  { %s2281_s3 = smov 256   ;;  %s2282_s10 = smov 16  }
  0x22   :  { %29 = dma.hbm_to_vmem [thread:$0]  %s2691_s1, 4096, %s24_s24, [#allocation3], %s2281_s3, %s2281_s3, %s2282_s10  }
  0x23   :  { %s2283_s15 = smov [#allocation6]   ;;  %s2251_s19 = scalar_lea.hbm %s2695_s5, 2048 }
  0x24   :  { %s51_s16 = sshll.u32 %s2283_s15, 4  ;;  %p2252_p2 = scmp.ne.s32.totalorder %s2695_s5, %s2251_s19  ;;  %s52_s16 = int_to_ptr.vmem [resolvable:$true] %s51_s16 }
  0x25   :  { %p2255_p3 = scmp.lt.u32.totalorder %s2251_s19, %s2695_s5 }
  0x27   :  { %p2257_p4 = pnand %p2255_p3, %p2252_p2 }
  0x29   :  { %2260 = shalt.err (!%p2257_p4)
}
  0x2a   :  { %s2261_s25 = scalar_lea.vmem %s52_s16, 2048  ;;  %p2266_p6 = scmp.lt.s32.totalorder %s52_s16, %s52_s16 }
  0x2b   :  { %p2262_p5 = scmp.ne.s32.totalorder %s52_s16, %s2261_s25  ;;  %p2267_p7 = scmp.lt.s32.totalorder %s2261_s25, %s2261_s25 }
  0x2d   :  { %p2268_p8 = por %p2267_p7, %p2266_p6 }
  0x2f   :  { %p2269_p9 = pnand %p2268_p8, %p2262_p5 }
  0x31   :  { %2272 = shalt.err (!%p2269_p9)
}
  0x32   :  { %s2284_s1 = smov 64   ;;  %s2285_s24 = smov 4  }
  0x33   :  { %57 = dma.hbm_to_vmem [thread:$0]  %s2695_s5, 2048, %s52_s16, [#allocation5], %s2284_s1, %s2284_s1, %s2285_s24  }
  0x34   :  { %2273 = dma.done.wait [#allocation3], 4096  }
  0x35   :  { %2274 = vsyncadd [#allocation3], 4294963200 }
  0x36   :  { %2275 = dma.done.wait [#allocation5], 10240  }
  0x37   :  { %2276 = vsyncadd [#allocation5], 4294957056  ;;  %v2286_v0 = vmov 0   ;;  %v2032_v1 = vld [vmem:[#allocation2 + $0x4] ss:$16 sps:$4 sm:$0xff]   ;;  %v2057_v36 = vld [vmem:[%s2690_s0 + $0x8] sm:$0xff]  }
  0x38   :  { %376 = vmatprep.mubr.bf16.mxu0 %v2286_v0  ;;  %479 = vmatprep.mubr.bf16.mxu1 %v2286_v0  ;;  %v2034_v2 = vld [vmem:[#allocation2] ss:$16 sps:$4 sm:$0xff]   ;;  %v2035_v3 = vld [vmem:[#allocation2 + $0x24] ss:$16 sps:$4 sm:$0xff]   ;;  %v2060_v12 = vld [vmem:[#allocation2 + $0xc] ss:$16 sps:$4 sm:$0xff]  }
  0x39   :  { %344 = vmatprep.subr.bf16.mxu0 %v2032_v1  ;;  %v2037_v4 = vld [vmem:[#allocation2 + $0x20] ss:$16 sps:$4 sm:$0xff]   ;;  %v2038_v5 = vld [vmem:[#allocation2 + $0x44] ss:$16 sps:$4 sm:$0xff]   ;;  %v2062_v13 = vld [vmem:[#allocation2 + $0x8] ss:$16 sps:$4 sm:$0xff]   ;;  %447 = vmatprep.subr.bf16.mxu1 %v2060_v12 }
  0x3a   :  { %345 = vmatpush1.bf16.msra.mxu0 %v2034_v2  ;;  %v2040_v6 = vld [vmem:[#allocation2 + $0x40] ss:$16 sps:$4 sm:$0xff]   ;;  %v2041_v7 = vld [vmem:[#allocation2 + $0x64] ss:$16 sps:$4 sm:$0xff]   ;;  %v2063_v14 = vld [vmem:[#allocation2 + $0x2c] ss:$16 sps:$4 sm:$0xff]   ;;  %448 = vmatpush1.bf16.msra.mxu1 %v2062_v13 }
  0x3b   :  { %346 = vmatprep.subr.bf16.mxu0 %v2035_v3  ;;  %v2043_v8 = vld [vmem:[#allocation2 + $0x60] ss:$16 sps:$4 sm:$0xff]   ;;  %v2044_v9 = vld [vmem:[#allocation2 + $0x84] ss:$16 sps:$4 sm:$0xff]   ;;  %v2065_v15 = vld [vmem:[#allocation2 + $0x28] ss:$16 sps:$4 sm:$0xff]   ;;  %449 = vmatprep.subr.bf16.mxu1 %v2063_v14 }
  0x3c   :  { %v2046_v10 = vld [vmem:[#allocation2 + $0x80] ss:$16 sps:$4 sm:$0xff]   ;;  %v2047_v11 = vld [vmem:[#allocation2 + $0xa4] ss:$16 sps:$4 sm:$0xff]   ;;  %v2067_v17 = vld [vmem:[#allocation2 + $0x4c] ss:$16 sps:$4 sm:$0xff]  }
  0x3d   :  { %v2049_v16 = vld [vmem:[#allocation2 + $0xa0] ss:$16 sps:$4 sm:$0xff]   ;;  %v2050_v18 = vld [vmem:[#allocation2 + $0xc4] ss:$16 sps:$4 sm:$0xff]   ;;  %v2069_v20 = vld [vmem:[#allocation2 + $0x48] ss:$16 sps:$4 sm:$0xff]  }
  0x3e   :  { %347 = vmatpush1.bf16.msra.mxu0 %v2037_v4  ;;  %v2052_v19 = vld [vmem:[#allocation2 + $0xc0] ss:$16 sps:$4 sm:$0xff]   ;;  %450 = vmatpush1.bf16.msra.mxu1 %v2065_v15  ;;  %v2070_v21 = vld [vmem:[#allocation2 + $0x6c] ss:$16 sps:$4 sm:$0xff]   ;;  %v2053_v22 = vld [vmem:[#allocation2 + $0xe4] ss:$16 sps:$4 sm:$0xff]  }
  0x3f   :  { %348 = vmatprep.subr.bf16.mxu0 %v2038_v5  ;;  %451 = vmatprep.subr.bf16.mxu1 %v2067_v17  ;;  %v2055_v23 = vld [vmem:[#allocation2 + $0xe0] ss:$16 sps:$4 sm:$0xff]   ;;  %v2072_v24 = vld [vmem:[#allocation2 + $0x68] ss:$16 sps:$4 sm:$0xff]   ;;  %v2074_v25 = vld [vmem:[#allocation2 + $0x8c] ss:$16 sps:$4 sm:$0xff]  }
  0x40   :  { %v2089_v26 = vld [vmem:[#allocation4 + $0x4] ss:$8 sps:$4 sm:$0xff]   ;;  %v2076_v28 = vld [vmem:[#allocation2 + $0x88] ss:$16 sps:$4 sm:$0xff]   ;;  %v2092_v31 = vld [vmem:[#allocation4 + $0x14] ss:$8 sps:$4 sm:$0xff]  }
  0x41   :  { %v2056_v27 = vld [vmem:[%s2690_s0] sm:$0xff]   ;;  %v2077_v29 = vld [vmem:[#allocation2 + $0xac] ss:$16 sps:$4 sm:$0xff]   ;;  %v2079_v32 = vld [vmem:[#allocation2 + $0xa8] ss:$16 sps:$4 sm:$0xff]   ;;  %vm2288_vm0 = vmmov 0  }
  0x42   :  { %349 = vmatpush1.bf16.msra.mxu0 %v2040_v6  ;;  %452 = vmatpush1.bf16.msra.mxu1 %v2069_v20  ;;  %v2087_v30 = vld [vmem:[#allocation4] ss:$8 sps:$4 sm:$0xff]   ;;  %v2081_v33 = vld [vmem:[#allocation2 + $0xcc] ss:$16 sps:$4 sm:$0xff]   ;;  %v2090_v34 = vld [vmem:[#allocation4 + $0x10] ss:$8 sps:$4 sm:$0xff]  }
  0x43   :  { %350 = vmatprep.subr.bf16.mxu0 %v2041_v7  ;;  %453 = vmatprep.subr.bf16.mxu1 %v2070_v21  ;;  %v2095_v35 = vld [vmem:[#allocation4 + $0x24] ss:$8 sps:$4 sm:$0xff]   ;;  %v2083_v37 = vld [vmem:[#allocation2 + $0xc8] ss:$16 sps:$4 sm:$0xff]   ;;  %v2098_v40 = vld [vmem:[#allocation4 + $0x34] ss:$8 sps:$4 sm:$0xff]  }
  0x44   :  { %v2084_v38 = vld [vmem:[#allocation2 + $0xec] ss:$16 sps:$4 sm:$0xff]   ;;  %v2093_v39 = vld [vmem:[#allocation4 + $0x20] ss:$8 sps:$4 sm:$0xff]   ;;  %v2096_v42 = vld [vmem:[#allocation4 + $0x30] ss:$8 sps:$4 sm:$0xff]  }
  0x45   :  { %v2086_v41 = vld [vmem:[#allocation2 + $0xe8] ss:$16 sps:$4 sm:$0xff]   ;;  %v2101_v43 = vld [vmem:[#allocation4 + $0x44] ss:$8 sps:$4 sm:$0xff]   ;;  %v2058_v44 = vld [vmem:[%s2690_s0 + $0x10] sm:$0xff]   ;;  %vm1697_vm1 = vcmask 523264  }
  0x46   :  { %351 = vmatpush1.bf16.msra.mxu0 %v2043_v8  ;;  %454 = vmatpush1.bf16.msra.mxu1 %v2072_v24  ;;  %v2099_v45 = vld [vmem:[#allocation4 + $0x40] ss:$8 sps:$4 sm:$0xff]   ;;  %v2104_v46 = vld [vmem:[#allocation4 + $0x54] ss:$8 sps:$4 sm:$0xff]   ;;  %v2102_v47 = vld [vmem:[#allocation4 + $0x50] ss:$8 sps:$4 sm:$0xff]  }
  0x47   :  { %352 = vmatprep.subr.bf16.mxu0 %v2044_v9  ;;  %455 = vmatprep.subr.bf16.mxu1 %v2074_v25  ;;  %v2107_v48 = vld [vmem:[#allocation4 + $0x64] ss:$8 sps:$4 sm:$0xff]   ;;  %v2059_v49 = vld [vmem:[%s2690_s0 + $0x18] sm:$0xff]   ;;  %v2105_v50 = vld [vmem:[#allocation4 + $0x60] ss:$8 sps:$4 sm:$0xff]  }
  0x48   :  { %v2110_v51 = vld [vmem:[#allocation4 + $0x74] ss:$8 sps:$4 sm:$0xff]   ;;  %v2108_v52 = vld [vmem:[#allocation4 + $0x70] ss:$8 sps:$4 sm:$0xff]   ;;  %v2113_v53 = vld [vmem:[#allocation4 + $0x84] ss:$8 sps:$4 sm:$0xff]  }
  0x49   :  { %v2066_v54 = vld [vmem:[%s2690_s0 + $0x20] sm:$0xff]   ;;  %v2116_v56 = vld [vmem:[#allocation4 + $0x94] ss:$8 sps:$4 sm:$0xff]   ;;  %v2114_v57 = vld [vmem:[#allocation4 + $0x90] ss:$8 sps:$4 sm:$0xff]  }
  0x4a   :  { %353 = vmatpush1.bf16.msra.mxu0 %v2046_v10  ;;  %456 = vmatpush1.bf16.msra.mxu1 %v2076_v28  ;;  %v2111_v55 = vld [vmem:[#allocation4 + $0x80] ss:$8 sps:$4 sm:$0xff]   ;;  %v2119_v58 = vld [vmem:[#allocation4 + $0xa4] ss:$8 sps:$4 sm:$0xff]   ;;  %v2122_v61 = vld [vmem:[#allocation4 + $0xb4] ss:$8 sps:$4 sm:$0xff]   ;;  %v122_v10 = vlaneseq }
  0x4b   :  { %354 = vmatprep.subr.bf16.mxu0 %v2047_v11  ;;  %457 = vmatprep.subr.bf16.mxu1 %v2077_v29  ;;  %v2073_v59 = vld [vmem:[%s2690_s0 + $0x28] sm:$0xff]   ;;  %v2120_v62 = vld [vmem:[#allocation4 + $0xb0] ss:$8 sps:$4 sm:$0xff]   ;;  %v2128_v3 = vld [vmem:[#allocation4 + $0xd4] ss:$8 sps:$4 sm:$0xff]  }
  0x4c   :  { %v2117_v60 = vld [vmem:[#allocation4 + $0xa0] ss:$8 sps:$4 sm:$0xff]   ;;  %v2125_v63 = vld [vmem:[#allocation4 + $0xc4] ss:$8 sps:$4 sm:$0xff]   ;;  %v2080_v1 = vld [vmem:[%s2690_s0 + $0x30] sm:$0xff]   ;;  %v2410_v11 = vshrl.u32 %v122_v10, 7 }
  0x4d   :  { %v2123_v2 = vld [vmem:[#allocation4 + $0xc0] ss:$8 sps:$4 sm:$0xff]   ;;  %v2126_v4 = vld [vmem:[#allocation4 + $0xd0] ss:$8 sps:$4 sm:$0xff]   ;;  %v2131_v5 = vld [vmem:[#allocation4 + $0xe4] ss:$8 sps:$4 sm:$0xff]  }
  0x4e   :  { %355 = vmatpush1.bf16.msra.mxu0 %v2049_v16  ;;  %458 = vmatpush1.bf16.msra.mxu1 %v2079_v32  ;;  %v2129_v6 = vld [vmem:[#allocation4 + $0xe0] ss:$8 sps:$4 sm:$0xff]   ;;  %v2134_v7 = vld [vmem:[#allocation4 + $0xf4] ss:$8 sps:$4 sm:$0xff]   ;;  %v2132_v8 = vld [vmem:[#allocation4 + $0xf0] ss:$8 sps:$4 sm:$0xff]  }
  0x4f   :  { %356 = vmatprep.subr.bf16.mxu0 %v2050_v18  ;;  %459 = vmatprep.subr.bf16.mxu1 %v2081_v33  ;;  %v2137_v9 = vld [vmem:[#allocation4 + $0x104] ss:$8 sps:$4 sm:$0xff]   ;;  %v124_v12 = vsub.s32 0, %v2410_v11  ;;  %v128_v13 = vsub.s32 1, %v2410_v11  ;;  %v2187_v20 = vld [vmem:[#allocation6 + $0x50] sm:$0xff]   ;;  %v2189_v29 = vld [vmem:[#allocation6 + $0x58] sm:$0xff]  }
  0x50   :  { %v2183_v14 = vld [vmem:[#allocation6 + $0x40] sm:$0xff]   ;;  %v2185_v16 = vld [vmem:[#allocation6 + $0x48] sm:$0xff]  }
  0x51   :  { %v2184_v15 = vld [vmem:[#allocation6] sm:$0xff]  }
  0x52   :  { %357 = vmatpush1.bf16.msra.mxu0 %v2052_v19  ;;  %460 = vmatpush1.bf16.msra.mxu1 %v2083_v37  ;;  %v2186_v19 = vld [vmem:[#allocation6 + $0x8] sm:$0xff]   ;;  %v2191_v37 = vld [vmem:[#allocation6 + $0x60] sm:$0xff]  }
  0x53   :  { %358 = vmatprep.subr.bf16.mxu0 %v2053_v22  ;;  %461 = vmatprep.subr.bf16.mxu1 %v2084_v38 }
  0x56   :  { %359 = vmatpush1.bf16.msra.mxu0 %v2055_v23  ;;  %462 = vmatpush1.bf16.msra.mxu1 %v2086_v41  ;;  %v132_v41 = vsub.s32 2, %v2410_v11 }
  0x57   :  { %1030 = vmatprep.subr.bf16.mxu0 %v2089_v26  ;;  %1847 = vmatprep.subr.bf16.mxu1 %v2183_v14  ;;  %v2188_v26 = vld [vmem:[#allocation6 + $0x10] sm:$0xff]  }
  0x59   :  { %377 = vmatmul.mubr.bf16.vlgmr.msra.gmra.mrb[0].mxu0 %v2056_v27  ;;  %480 = vmatmul.mubr.bf16.vlgmr.msra.gmra.mrb[0].mxu1 %v2056_v27 }
  0x5a   :  { %386 = vmatprep.mubr.bf16.mxu0 %v2286_v0  ;;  %1031 = vmatpush1.bf16.msra.mxu0 %v2087_v30 }
  0x5b   :  { %1032 = vmatprep.subr.bf16.mxu0 %v2092_v31  ;;  %489 = vmatprep.mubr.bf16.mxu1 %v2286_v0 }
  0x5c   :  { %1848 = vmatpush3.bf16.msra.mxu1 %v2184_v15 }
  0x5d   :  { %1849 = vmatprep.subr.bf16.mxu1 %v2185_v16 }
  0x5e   :  { %1033 = vmatpush1.bf16.msra.mxu0 %v2090_v34 }
  0x5f   :  { %1034 = vmatprep.subr.bf16.mxu0 %v2095_v35  ;;  %v2190_v35 = vld [vmem:[#allocation6 + $0x18] sm:$0xff]  }
  0x60   :  { %1850 = vmatpush3.bf16.msra.mxu1 %v2186_v19 }
  0x61   :  { %387 = vmatmul.mubr.bf16.gmra.mrb[4].mxu0 %v2057_v36  ;;  %490 = vmatmul.mubr.bf16.gmra.mrb[4].mxu1 %v2057_v36 }
  0x62   :  { %396 = vmatprep.mubr.bf16.mxu0 %v2286_v0  ;;  %1035 = vmatpush1.bf16.msra.mxu0 %v2093_v39  ;;  %v2135_v39 = vld [vmem:[#allocation4 + $0x100] ss:$8 sps:$4 sm:$0xff]  }
  0x63   :  { %1036 = vmatprep.subr.bf16.mxu0 %v2098_v40  ;;  %499 = vmatprep.mubr.bf16.mxu1 %v2286_v0 }
  0x64   :  { %1851 = vmatprep.subr.bf16.mxu1 %v2187_v20 }
  0x65   :  { %1852 = vmatpush3.bf16.msra.mxu1 %v2188_v26 }
  0x66   :  { %1037 = vmatpush1.bf16.msra.mxu0 %v2096_v42  ;;  %1853 = vmatprep.subr.bf16.mxu1 %v2189_v29  ;;  %v2144_v29 = vld [vmem:[#allocation4 + $0x130] ss:$8 sps:$4 sm:$0xff]  }
  0x67   :  { %1038 = vmatprep.subr.bf16.mxu0 %v2101_v43 }
  0x69   :  { %397 = vmatmul.mubr.bf16.gmra.mrb[8].mxu0 %v2058_v44  ;;  %500 = vmatmul.mubr.bf16.gmra.mrb[8].mxu1 %v2058_v44  ;;  %v2140_v44 = vld [vmem:[#allocation4 + $0x114] ss:$8 sps:$4 sm:$0xff]  }
  0x6a   :  { %406 = vmatprep.mubr.bf16.mxu0 %v2286_v0  ;;  %1039 = vmatpush1.bf16.msra.mxu0 %v2099_v45  ;;  %v136_v45 = vsub.s32 3, %v2410_v11 }
  0x6b   :  { %1040 = vmatprep.subr.bf16.mxu0 %v2104_v46  ;;  %509 = vmatprep.mubr.bf16.mxu1 %v2286_v0 }
  0x6c   :  { %1854 = vmatpush3.bf16.msra.mxu1 %v2190_v35 }
  0x6d   :  { %1855 = vmatprep.subr.bf16.mxu1 %v2191_v37 }
  0x6e   :  { %1041 = vmatpush1.bf16.msra.mxu0 %v2102_v47 }
  0x6f   :  { %1042 = vmatprep.subr.bf16.mxu0 %v2107_v48  ;;  %v2192_v48 = vld [vmem:[#allocation6 + $0x20] sm:$0xff]  }
  0x70   :  { %1856 = vmatpush3.bf16.msra.mxu1 %v2192_v48 }
  0x71   :  { %407 = vmatmul.mubr.bf16.gmra.mrb[12].mxu0 %v2059_v49  ;;  %510 = vmatmul.mubr.bf16.gmra.mrb[12].mxu1 %v2059_v49 }
  0x72   :  { %416 = vmatprep.mubr.bf16.mxu0 %v2286_v0  ;;  %1043 = vmatpush1.bf16.msra.mxu0 %v2105_v50 }
  0x73   :  { %1044 = vmatprep.subr.bf16.mxu0 %v2110_v51  ;;  %519 = vmatprep.mubr.bf16.mxu1 %v2286_v0 }
  0x76   :  { %1045 = vmatpush1.bf16.msra.mxu0 %v2108_v52  ;;  %v2193_v52 = vld [vmem:[#allocation6 + $0x68] sm:$0xff]  }
  0x77   :  { %1046 = vmatprep.subr.bf16.mxu0 %v2113_v53  ;;  %1857 = vmatprep.subr.bf16.mxu1 %v2193_v52 }
  0x79   :  { %417 = vmatmul.mubr.bf16.gmra.mrb[16].mxu0 %v2066_v54  ;;  %520 = vmatmul.mubr.bf16.gmra.mrb[16].mxu1 %v2066_v54 }
  0x7a   :  { %426 = vmatprep.mubr.bf16.mxu0 %v2286_v0  ;;  %1047 = vmatpush1.bf16.msra.mxu0 %v2111_v55  ;;  %v2138_v55 = vld [vmem:[#allocation4 + $0x110] ss:$8 sps:$4 sm:$0xff]  }
  0x7b   :  { %1048 = vmatprep.subr.bf16.mxu0 %v2116_v56  ;;  %529 = vmatprep.mubr.bf16.mxu1 %v2286_v0 }
  0x7e   :  { %1049 = vmatpush1.bf16.msra.mxu0 %v2114_v57 }
  0x7f   :  { %1050 = vmatprep.subr.bf16.mxu0 %v2119_v58  ;;  %v2143_v58 = vld [vmem:[#allocation4 + $0x124] ss:$8 sps:$4 sm:$0xff]  }
  0x81   :  { %427 = vmatmul.mubr.bf16.gmra.mrb[20].mxu0 %v2073_v59  ;;  %530 = vmatmul.mubr.bf16.gmra.mrb[20].mxu1 %v2073_v59 }
  0x82   :  { %436 = vmatprep.mubr.bf16.mxu0 %v2286_v0  ;;  %1051 = vmatpush1.bf16.msra.mxu0 %v2117_v60 }
  0x83   :  { %1052 = vmatprep.subr.bf16.mxu0 %v2122_v61  ;;  %539 = vmatprep.mubr.bf16.mxu1 %v2286_v0  ;;  %v120_v0 = vld [vmem:[%s2692_s2] sm:$0xf]  ;;  %v2194_v61 = vld [vmem:[#allocation6 + $0x28] sm:$0xff]  }
  0x84   :  { %v2419_v17 = vrot.slane %v120_v0, %v124_v12  ;;  %v2423_v18 = vrot.slane %v120_v0, %v128_v13  ;;  %v2435_v56 = vrot.slane %v120_v0, %v132_v41  ;;  %v2437_v59 = vrot.slane %v120_v0, %v136_v45  ;;  %1858 = vmatpush3.bf16.msra.mxu1 %v2194_v61 }
  0x86   :  { %1053 = vmatpush1.bf16.msra.mxu0 %v2120_v62 }
  0x87   :  { %1054 = vmatprep.subr.bf16.mxu0 %v2125_v63 }
  0x89   :  { %437 = vmatmul.mubr.bf16.gmra.mrb[24].mxu0 %v2080_v1  ;;  %540 = vmatmul.mubr.bf16.gmra.mrb[24].mxu1 %v2080_v1  ;;  %v2195_v1 = vld [vmem:[#allocation6 + $0x70] sm:$0xff]  }
  0x8a   :  { %1055 = vmatpush1.bf16.msra.mxu0 %v2123_v2  ;;  %1859 = vmatprep.subr.bf16.mxu1 %v2195_v1 }
  0x8b   :  { %1056 = vmatprep.subr.bf16.mxu0 %v2128_v3  ;;  %v2141_v3 = vld [vmem:[#allocation4 + $0x120] ss:$8 sps:$4 sm:$0xff]  }
  0x8e   :  { %1057 = vmatpush1.bf16.msra.mxu0 %v2126_v4 }
  0x8f   :  { %1058 = vmatprep.subr.bf16.mxu0 %v2131_v5 }
  0x92   :  { %1059 = vmatpush1.bf16.msra.mxu0 %v2129_v6 }
  0x93   :  { %1060 = vmatprep.subr.bf16.mxu0 %v2134_v7 }
  0x96   :  { %1061 = vmatpush1.bf16.msra.mxu0 %v2132_v8 }
  0x97   :  { %1133 = vmatprep.subr.bf16.mxu0 %v2137_v9  ;;  %v2146_v9 = vld [vmem:[#allocation4 + $0x134] ss:$8 sps:$4 sm:$0xff]  }
 0x12c   :  { %v378_v21 = vpop.f32.mrb[0].mxu0  ;;  %v481_v63 = vpop.f32.mrb[0].mxu1 }
 0x12d   :  { %v379_v22 = vadd.f32 %v378_v21, %v2419_v17  ;;  %v380_v23 = vpop.f32.mrb[1].mxu0  ;;  %v482_v5 = vadd.f32 %v481_v63, %v2435_v56  ;;  %v483_v6 = vpop.f32.mrb[1].mxu1  ;;  %v2196_v21 = vld [vmem:[#allocation6 + $0x30] sm:$0xff]  }
 0x12e   :  { %v381_v24 = vadd.f32 %v380_v23, %v2423_v18  ;;  %v382_v25 = vpop.f32.mrb[2].mxu0  ;;  %v484_v10 = vadd.f32 %v483_v6, %v2437_v59  ;;  %v485_v0 = vpop.f32.mrb[2].mxu1  ;;  %1860 = vmatpush3.bf16.msra.mxu1 %v2196_v21  ;;  %v2150_v63 = vld [vmem:[#allocation4 + $0x150] ss:$8 sps:$4 sm:$0xff]   ;;  %v2158_v21 = vld [vmem:[#allocation4 + $0x174] ss:$8 sps:$4 sm:$0xff]  }
 0x12f   :  { %v383_v27 = vadd.f32 %v382_v25, %v2419_v17  ;;  %v384_v28 = vpop.f32.mrb[3].mxu0  ;;  %v550_v31 = vmax.f32 %v379_v22, 0.0  ;;  %v552_v16 = vmax.f32 %v482_v5, 0.0  ;;  %v486_v19 = vadd.f32 %v485_v0, %v2435_v56  ;;  %v487_v20 = vpop.f32.mrb[3].mxu1  ;;  %v2153_v0 = vld [vmem:[#allocation4 + $0x160] ss:$8 sps:$4 sm:$0xff]  }
 0x130   :  { %v385_v30 = vadd.f32 %v384_v28, %v2423_v18  ;;  %v551_v33 = vmax.f32 %v381_v24, 0.0  ;;  %v553_v25 = vmax.f32 %v484_v10, 0.0  ;;  %v488_v26 = vadd.f32 %v487_v20, %v2437_v59 }
 0x131   :  { %v554_v32 = vmax.f32 %v383_v27, 0.0 }
 0x132   :  { %v555_v34 = vmax.f32 %v385_v30, 0.0  ;;  %v556_v30 = vmax.f32 %v486_v19, 0.0 }
 0x133   :  { %v606_v36 = vpack.c.bf16 %v554_v32, %v550_v31  ;;  %v2149_v32 = vld [vmem:[#allocation4 + $0x144] ss:$8 sps:$4 sm:$0xff]  }
 0x134   :  { %v607_v38 = vpack.c.bf16 %v555_v34, %v551_v33  ;;  %v388_v40 = vpop.f32.mrb[4].mxu0  ;;  %v557_v33 = vmax.f32 %v488_v26, 0.0  ;;  %v2447_v35 = vpack.c.bf16 %v556_v30, %v552_v16 }
 0x135   :  { %v389_v42 = vadd.f32 %v388_v40, %v2419_v17  ;;  %v390_v43 = vpop.f32.mrb[5].mxu0  ;;  %v2147_v40 = vld [vmem:[#allocation4 + $0x140] ss:$8 sps:$4 sm:$0xff]  }
 0x136   :  { %1062 = vmatprep.mubr.bf16.mxu0 %v607_v38  ;;  %v391_v46 = vadd.f32 %v390_v43, %v2423_v18  ;;  %v392_v47 = vpop.f32.mrb[6].mxu0  ;;  %v2449_v37 = vpack.c.bf16 %v557_v33, %v553_v25  ;;  %v491_v38 = vpop.f32.mrb[4].mxu1 }
 0x137   :  { %v558_v49 = vmax.f32 %v389_v42, 0.0  ;;  %1063 = vmatmul.mubr.bf16.vlgmr.msra.gmra.mrb[28].mxu0 %v606_v36  ;;  %v393_v50 = vadd.f32 %v392_v47, %v2419_v17  ;;  %v394_v51 = vpop.f32.mrb[7].mxu0  ;;  %v492_v42 = vadd.f32 %v491_v38, %v2435_v56  ;;  %v493_v43 = vpop.f32.mrb[5].mxu1  ;;  %v2156_v38 = vld [vmem:[#allocation4 + $0x170] ss:$8 sps:$4 sm:$0xff]  }
 0x138   :  { %1134 = vmatpush1.bf16.msra.mxu0 %v2135_v39  ;;  %v559_v53 = vmax.f32 %v391_v46, 0.0  ;;  %v395_v54 = vadd.f32 %v394_v51, %v2423_v18  ;;  %v2152_v46 = vld [vmem:[#allocation4 + $0x154] ss:$8 sps:$4 sm:$0xff]   ;;  %v494_v47 = vadd.f32 %v493_v43, %v2437_v59  ;;  %v495_v48 = vpop.f32.mrb[6].mxu1 }
 0x139   :  { %v562_v57 = vmax.f32 %v393_v50, 0.0  ;;  %1135 = vmatprep.subr.bf16.mxu0 %v2140_v44  ;;  %v560_v51 = vmax.f32 %v492_v42, 0.0  ;;  %v496_v52 = vadd.f32 %v495_v48, %v2435_v56 }
 0x13a   :  { %v563_v60 = vmax.f32 %v395_v54, 0.0 }
 0x13b   :  { %v610_v62 = vpack.c.bf16 %v562_v57, %v558_v49  ;;  %v564_v1 = vmax.f32 %v496_v52, 0.0 }
 0x13c   :  { %v611_v2 = vpack.c.bf16 %v563_v60, %v559_v53  ;;  %1136 = vmatpush1.bf16.msra.mxu0 %v2138_v55  ;;  %v398_v4 = vpop.f32.mrb[8].mxu0  ;;  %v497_v53 = vpop.f32.mrb[7].mxu1 }
 0x13d   :  { %1137 = vmatprep.subr.bf16.mxu0 %v2143_v58  ;;  %v399_v7 = vadd.f32 %v398_v4, %v2419_v17  ;;  %v400_v8 = vpop.f32.mrb[9].mxu0  ;;  %v561_v58 = vmax.f32 %v494_v47, 0.0  ;;  %v498_v60 = vadd.f32 %v497_v53, %v2437_v59  ;;  %v2459_v6 = vpack.c.bf16 %v564_v1, %v560_v51 }
 0x13e   :  { %v401_v14 = vadd.f32 %v400_v8, %v2423_v18  ;;  %v402_v15 = vpop.f32.mrb[10].mxu0  ;;  %1072 = vmatprep.mubr.bf16.mxu0 %v611_v2 }
 0x13f   :  { %v566_v22 = vmax.f32 %v399_v7, 0.0  ;;  %v403_v23 = vadd.f32 %v402_v15, %v2419_v17  ;;  %v404_v24 = vpop.f32.mrb[11].mxu0  ;;  %1073 = vmatmul.mubr.bf16.gmra.mrb[32].mxu0 %v610_v62  ;;  %v565_v4 = vmax.f32 %v498_v60, 0.0 }
 0x140   :  { %1138 = vmatpush1.bf16.msra.mxu0 %v2141_v3  ;;  %v567_v27 = vmax.f32 %v401_v14, 0.0  ;;  %v405_v28 = vadd.f32 %v404_v24, %v2423_v18  ;;  %v2155_v3 = vld [vmem:[#allocation4 + $0x164] ss:$8 sps:$4 sm:$0xff]  }
 0x141   :  { %v570_v31 = vmax.f32 %v403_v23, 0.0  ;;  %1139 = vmatprep.subr.bf16.mxu0 %v2146_v9  ;;  %v2461_v8 = vpack.c.bf16 %v565_v4, %v561_v58  ;;  %v501_v9 = vpop.f32.mrb[8].mxu1 }
 0x142   :  { %v571_v34 = vmax.f32 %v405_v28, 0.0  ;;  %v502_v15 = vadd.f32 %v501_v9, %v2435_v56  ;;  %v503_v16 = vpop.f32.mrb[9].mxu1 }
 0x143   :  { %v614_v36 = vpack.c.bf16 %v570_v31, %v566_v22  ;;  %v504_v22 = vadd.f32 %v503_v16, %v2437_v59  ;;  %v505_v23 = vpop.f32.mrb[10].mxu1  ;;  %v2167_v16 = vld [vmem:[#allocation4 + $0x1a4] ss:$8 sps:$4 sm:$0xff]  }
 0x144   :  { %v615_v39 = vpack.c.bf16 %v571_v34, %v567_v27  ;;  %1140 = vmatpush1.bf16.msra.mxu0 %v2144_v29  ;;  %v408_v41 = vpop.f32.mrb[12].mxu0  ;;  %v568_v26 = vmax.f32 %v502_v15, 0.0  ;;  %v506_v27 = vadd.f32 %v505_v23, %v2435_v56  ;;  %v507_v28 = vpop.f32.mrb[11].mxu1 }
 0x145   :  { %1141 = vmatprep.subr.bf16.mxu0 %v2149_v32  ;;  %v409_v44 = vadd.f32 %v408_v41, %v2419_v17  ;;  %v410_v45 = vpop.f32.mrb[13].mxu0  ;;  %v569_v32 = vmax.f32 %v504_v22, 0.0  ;;  %v508_v33 = vadd.f32 %v507_v28, %v2437_v59  ;;  %v2161_v41 = vld [vmem:[#allocation4 + $0x184] ss:$8 sps:$4 sm:$0xff]   ;;  %v511_v47 = vpop.f32.mrb[12].mxu1 }
 0x146   :  { %v411_v49 = vadd.f32 %v410_v45, %v2423_v18  ;;  %v412_v50 = vpop.f32.mrb[14].mxu0  ;;  %1082 = vmatprep.mubr.bf16.mxu0 %v615_v39  ;;  %v572_v39 = vmax.f32 %v506_v27, 0.0  ;;  %v512_v51 = vadd.f32 %v511_v47, %v2435_v56  ;;  %v513_v52 = vpop.f32.mrb[13].mxu1 }
 0x147   :  { %v574_v54 = vmax.f32 %v409_v44, 0.0  ;;  %v413_v55 = vadd.f32 %v412_v50, %v2419_v17  ;;  %v414_v57 = vpop.f32.mrb[15].mxu0  ;;  %1083 = vmatmul.mubr.bf16.gmra.mrb[36].mxu0 %v614_v36  ;;  %v573_v42 = vmax.f32 %v508_v33, 0.0  ;;  %v515_v58 = vpop.f32.mrb[14].mxu1 }
 0x148   :  { %1142 = vmatpush1.bf16.msra.mxu0 %v2147_v40  ;;  %v575_v61 = vmax.f32 %v411_v49, 0.0  ;;  %v415_v62 = vadd.f32 %v414_v57, %v2423_v18  ;;  %v2471_v44 = vpack.c.bf16 %v572_v39, %v568_v26  ;;  %v2159_v49 = vld [vmem:[#allocation4 + $0x180] ss:$8 sps:$4 sm:$0xff]   ;;  %v514_v57 = vadd.f32 %v513_v52, %v2437_v59  ;;  %v517_v1 = vpop.f32.mrb[15].mxu1 }
 0x149   :  { %v578_v2 = vmax.f32 %v413_v55, 0.0  ;;  %1143 = vmatprep.subr.bf16.mxu0 %v2152_v46  ;;  %v2473_v46 = vpack.c.bf16 %v573_v42, %v569_v32  ;;  %v2164_v55 = vld [vmem:[#allocation4 + $0x194] ss:$8 sps:$4 sm:$0xff]   ;;  %v2165_v26 = vld [vmem:[#allocation4 + $0x1a0] ss:$8 sps:$4 sm:$0xff]  }
 0x14a   :  { %v579_v5 = vmax.f32 %v415_v62, 0.0  ;;  %v576_v62 = vmax.f32 %v512_v51, 0.0  ;;  %v2170_v32 = vld [vmem:[#allocation4 + $0x1b4] ss:$8 sps:$4 sm:$0xff]   ;;  %v2168_v51 = vld [vmem:[#allocation4 + $0x1b0] ss:$8 sps:$4 sm:$0xff]  }
 0x14b   :  { %v618_v7 = vpack.c.bf16 %v578_v2, %v574_v54 }
 0x14c   :  { %v619_v10 = vpack.c.bf16 %v579_v5, %v575_v61  ;;  %1144 = vmatpush1.bf16.msra.mxu0 %v2150_v63  ;;  %v418_v14 = vpop.f32.mrb[16].mxu0  ;;  %v516_v63 = vadd.f32 %v515_v58, %v2435_v56  ;;  %v577_v5 = vmax.f32 %v514_v57, 0.0 }
 0x14d   :  { %1145 = vmatprep.subr.bf16.mxu0 %v2155_v3  ;;  %v419_v19 = vadd.f32 %v418_v14, %v2419_v17  ;;  %v420_v20 = vpop.f32.mrb[17].mxu0 }
 0x14e   :  { %v421_v24 = vadd.f32 %v420_v20, %v2423_v18  ;;  %v422_v25 = vpop.f32.mrb[18].mxu0  ;;  %1092 = vmatprep.mubr.bf16.mxu0 %v619_v10  ;;  %v580_v14 = vmax.f32 %v516_v63, 0.0  ;;  %v2171_v63 = vld [vmem:[#allocation4 + $0x1c0] ss:$8 sps:$4 sm:$0xff]  }
 0x14f   :  { %v582_v29 = vmax.f32 %v419_v19, 0.0  ;;  %v423_v30 = vadd.f32 %v422_v25, %v2419_v17  ;;  %v424_v31 = vpop.f32.mrb[19].mxu0  ;;  %1093 = vmatmul.mubr.bf16.gmra.mrb[40].mxu0 %v618_v7  ;;  %v518_v7 = vadd.f32 %v517_v1, %v2437_v59 }
 0x150   :  { %1146 = vmatpush1.bf16.msra.mxu0 %v2153_v0  ;;  %v583_v34 = vmax.f32 %v421_v24, 0.0  ;;  %v425_v36 = vadd.f32 %v424_v31, %v2423_v18  ;;  %v2162_v0 = vld [vmem:[#allocation4 + $0x190] ss:$8 sps:$4 sm:$0xff]   ;;  %v521_v24 = vpop.f32.mrb[16].mxu1 }
 0x151   :  { %v586_v40 = vmax.f32 %v423_v30, 0.0  ;;  %1147 = vmatprep.subr.bf16.mxu0 %v2158_v21  ;;  %v581_v19 = vmax.f32 %v518_v7, 0.0  ;;  %v2483_v21 = vpack.c.bf16 %v580_v14, %v576_v62  ;;  %v522_v28 = vadd.f32 %v521_v24, %v2435_v56  ;;  %v2174_v14 = vld [vmem:[#allocation4 + $0x1d0] ss:$8 sps:$4 sm:$0xff]  }
 0x152   :  { %v587_v43 = vmax.f32 %v425_v36, 0.0 }
 0x153   :  { %v622_v45 = vpack.c.bf16 %v586_v40, %v582_v29  ;;  %v2485_v23 = vpack.c.bf16 %v581_v19, %v577_v5  ;;  %v523_v29 = vpop.f32.mrb[17].mxu1  ;;  %v584_v39 = vmax.f32 %v522_v28, 0.0  ;;  %v2182_v28 = vld [vmem:[#allocation4 + $0x1f4] ss:$8 sps:$4 sm:$0xff]  }
 0x154   :  { %v623_v48 = vpack.c.bf16 %v587_v43, %v583_v34  ;;  %1148 = vmatpush1.bf16.msra.mxu0 %v2156_v38  ;;  %v428_v50 = vpop.f32.mrb[20].mxu0  ;;  %v524_v33 = vadd.f32 %v523_v29, %v2437_v59  ;;  %v525_v34 = vpop.f32.mrb[18].mxu1 }
 0x155   :  { %1149 = vmatprep.subr.bf16.mxu0 %v2161_v41  ;;  %v429_v53 = vadd.f32 %v428_v50, %v2419_v17  ;;  %v430_v54 = vpop.f32.mrb[21].mxu0  ;;  %v526_v40 = vadd.f32 %v525_v34, %v2435_v56  ;;  %v527_v41 = vpop.f32.mrb[19].mxu1 }
 0x156   :  { %v431_v60 = vadd.f32 %v430_v54, %v2423_v18  ;;  %v432_v61 = vpop.f32.mrb[22].mxu0  ;;  %1102 = vmatprep.mubr.bf16.mxu0 %v623_v48  ;;  %v585_v47 = vmax.f32 %v524_v33, 0.0  ;;  %v528_v48 = vadd.f32 %v527_v41, %v2437_v59  ;;  %v2173_v54 = vld [vmem:[#allocation4 + $0x1c4] ss:$8 sps:$4 sm:$0xff]  }
 0x157   :  { %v590_v2 = vmax.f32 %v429_v53, 0.0  ;;  %v433_v3 = vadd.f32 %v432_v61, %v2419_v17  ;;  %v434_v4 = vpop.f32.mrb[23].mxu0  ;;  %1103 = vmatmul.mubr.bf16.gmra.mrb[44].mxu0 %v622_v45  ;;  %v588_v52 = vmax.f32 %v526_v40, 0.0 }
 0x158   :  { %1150 = vmatpush1.bf16.msra.mxu0 %v2159_v49  ;;  %v591_v9 = vmax.f32 %v431_v60, 0.0  ;;  %v435_v10 = vadd.f32 %v434_v4, %v2423_v18 }
 0x159   :  { %v594_v15 = vmax.f32 %v433_v3, 0.0  ;;  %1151 = vmatprep.subr.bf16.mxu0 %v2164_v55  ;;  %v589_v55 = vmax.f32 %v528_v48, 0.0  ;;  %v624_v58 = vpack.c.bf16 %v588_v52, %v584_v39  ;;  %v2176_v3 = vld [vmem:[#allocation4 + $0x1d4] ss:$8 sps:$4 sm:$0xff]  }
 0x15a   :  { %v595_v20 = vmax.f32 %v435_v10, 0.0 }
 0x15b   :  { %v626_v22 = vpack.c.bf16 %v594_v15, %v590_v2  ;;  %v625_v61 = vpack.c.bf16 %v589_v55, %v585_v47 }
 0x15c   :  { %v627_v25 = vpack.c.bf16 %v595_v20, %v591_v9  ;;  %1152 = vmatpush1.bf16.msra.mxu0 %v2162_v0  ;;  %v438_v27 = vpop.f32.mrb[24].mxu0 }
 0x15d   :  { %1153 = vmatprep.subr.bf16.mxu0 %v2167_v16  ;;  %v439_v30 = vadd.f32 %v438_v27, %v2419_v17  ;;  %v440_v31 = vpop.f32.mrb[25].mxu0  ;;  %v2179_v16 = vld [vmem:[#allocation4 + $0x1e4] ss:$8 sps:$4 sm:$0xff]  }
 0x15e   :  { %v441_v36 = vadd.f32 %v440_v31, %v2423_v18  ;;  %v442_v38 = vpop.f32.mrb[26].mxu0  ;;  %1112 = vmatprep.mubr.bf16.mxu0 %v627_v25  ;;  %v2177_v25 = vld [vmem:[#allocation4 + $0x1e0] ss:$8 sps:$4 sm:$0xff]  }
 0x15f   :  { %v598_v42 = vmax.f32 %v439_v30, 0.0  ;;  %v443_v43 = vadd.f32 %v442_v38, %v2419_v17  ;;  %v444_v45 = vpop.f32.mrb[27].mxu0  ;;  %1113 = vmatmul.mubr.bf16.gmra.mrb[48].mxu0 %v626_v22  ;;  %v531_v17 = vpop.f32.mrb[20].mxu1 }
 0x160   :  { %1154 = vmatpush1.bf16.msra.mxu0 %v2165_v26  ;;  %v599_v49 = vmax.f32 %v441_v36, 0.0  ;;  %v445_v50 = vadd.f32 %v444_v45, %v2423_v18  ;;  %v532_v1 = vadd.f32 %v531_v17, %v2435_v56  ;;  %v533_v2 = vpop.f32.mrb[21].mxu1  ;;  %v2180_v36 = vld [vmem:[#allocation4 + $0x1f0] ss:$8 sps:$4 sm:$0xff]  }
 0x161   :  { %v602_v53 = vmax.f32 %v443_v43, 0.0  ;;  %1155 = vmatprep.subr.bf16.mxu0 %v2170_v32  ;;  %v534_v18 = vadd.f32 %v533_v2, %v2437_v59  ;;  %v535_v4 = vpop.f32.mrb[22].mxu1 }
 0x162   :  { %v603_v57 = vmax.f32 %v445_v50, 0.0  ;;  %v592_v5 = vmax.f32 %v532_v1, 0.0  ;;  %v536_v7 = vadd.f32 %v535_v4, %v2435_v56  ;;  %v537_v9 = vpop.f32.mrb[23].mxu1 }
 0x163   :  { %v630_v60 = vpack.c.bf16 %v602_v53, %v598_v42  ;;  %v593_v10 = vmax.f32 %v534_v18, 0.0  ;;  %v538_v0 = vadd.f32 %v537_v9, %v2437_v59  ;;  %v541_v24 = vpop.f32.mrb[24].mxu1  ;;  %v2199_v53 = vld [vmem:[%s2697_s7] sm:$0xff]  }
 0x164   :  { %v631_v62 = vpack.c.bf16 %v603_v57, %v599_v49  ;;  %1156 = vmatpush1.bf16.msra.mxu0 %v2168_v51  ;;  %v596_v15 = vmax.f32 %v536_v7, 0.0  ;;  %v542_v26 = vadd.f32 %v541_v24, %v2435_v56  ;;  %v543_v27 = vpop.f32.mrb[25].mxu1  ;;  %v2201_v7 = vld [vmem:[%s2697_s7 + $0x10] sm:$0xff]  }
 0x165   :  { %1157 = vmatprep.subr.bf16.mxu0 %v2173_v54  ;;  %v597_v19 = vmax.f32 %v538_v0, 0.0  ;;  %v544_v29 = vadd.f32 %v543_v27, %v2437_v59  ;;  %v545_v30 = vpop.f32.mrb[26].mxu1 }
 0x166   :  { %1122 = vmatprep.mubr.bf16.mxu0 %v631_v62  ;;  %v628_v20 = vpack.c.bf16 %v596_v15, %v592_v5  ;;  %v600_v31 = vmax.f32 %v542_v26, 0.0  ;;  %v547_v32 = vpop.f32.mrb[27].mxu1  ;;  %v2200_v62 = vld [vmem:[%s2697_s7 + $0x8] sm:$0xff]  }
 0x167   :  { %1123 = vmatmul.mubr.bf16.gmra.mrb[52].mxu0 %v630_v60  ;;  %v629_v22 = vpack.c.bf16 %v597_v19, %v593_v10  ;;  %v601_v33 = vmax.f32 %v544_v29, 0.0  ;;  %v548_v34 = vadd.f32 %v547_v32, %v2437_v59  ;;  %v2198_v59 = vld [vmem:[#allocation6 + $0x38] sm:$0xff]  }
 0x168   :  { %1158 = vmatpush1.bf16.msra.mxu0 %v2171_v63  ;;  %1165 = vmatprep.mubr.bf16.mxu0 %v2449_v37  ;;  %v546_v37 = vadd.f32 %v545_v30, %v2435_v56  ;;  %v2197_v56 = vld [vmem:[#allocation6 + $0x78] sm:$0xff]   ;;  %v2203_v30 = vld [vmem:[%s2697_s7 + $0x20] sm:$0xff]  }
 0x169   :  { %1159 = vmatprep.subr.bf16.mxu0 %v2176_v3  ;;  %v605_v39 = vmax.f32 %v548_v34, 0.0  ;;  %1861 = vmatprep.subr.bf16.mxu1 %v2197_v56 }
 0x16a   :  { %v604_v38 = vmax.f32 %v546_v37, 0.0  ;;  %1862 = vmatpush3.bf16.msra.mxu1 %v2198_v59 }
 0x16b   :  { %v633_v41 = vpack.c.bf16 %v605_v39, %v601_v33  ;;  %v2204_v39 = vld [vmem:[%s2697_s7 + $0x28] sm:$0xff]  }
 0x16c   :  { %1160 = vmatpush1.bf16.msra.mxu0 %v2174_v14  ;;  %v632_v40 = vpack.c.bf16 %v604_v38, %v600_v31 }
 0x16d   :  { %1161 = vmatprep.subr.bf16.mxu0 %v2179_v16 }
 0x170   :  { %1162 = vmatpush1.bf16.msra.mxu0 %v2177_v25 }
 0x171   :  { %1163 = vmatprep.subr.bf16.mxu0 %v2182_v28 }
 0x174   :  { %1164 = vmatpush1.bf16.msra.mxu0 %v2180_v36 }
 0x177   :  { %1166 = vmatmul.mubr.bf16.vlgmr.msra.gmra.mrb[28].mxu0 %v2447_v35  ;;  %v2287_v35 = vmov 0.0  }
 0x178   :  { %1175 = vmatprep.mubr.bf16.mxu0 %v2461_v8  ;;  %1920 = vmatprep.subr.bf16.mxu1 %v2287_v35 }
 0x17f   :  { %1176 = vmatmul.mubr.bf16.gmra.mrb[32].mxu0 %v2459_v6  ;;  %v698_v6 = vld [vmem:[%s2694_s4] sm:$0x3] }
 0x180   :  { %1185 = vmatprep.mubr.bf16.mxu0 %v2473_v46  ;;  %v2517_v8 = vrot.slane %v698_v6, %v124_v12 }
 0x187   :  { %1186 = vmatmul.mubr.bf16.gmra.mrb[36].mxu0 %v2471_v44  ;;  %v2521_v44 = vrot.slane %v698_v6, %v128_v13 }
 0x188   :  { %1195 = vmatprep.mubr.bf16.mxu0 %v2485_v23 }
 0x18f   :  { %1196 = vmatmul.mubr.bf16.gmra.mrb[40].mxu0 %v2483_v21 }
 0x190   :  { %1205 = vmatprep.mubr.bf16.mxu0 %v625_v61 }
 0x197   :  { %1206 = vmatmul.mubr.bf16.gmra.mrb[44].mxu0 %v624_v58 }
 0x198   :  { %1215 = vmatprep.mubr.bf16.mxu0 %v629_v22 }
 0x19f   :  { %1216 = vmatmul.mubr.bf16.gmra.mrb[48].mxu0 %v628_v20  ;;  %v2202_v20 = vld [vmem:[%s2697_s7 + $0x18] sm:$0xff]  }
 0x1a0   :  { %1225 = vmatprep.mubr.bf16.mxu0 %v633_v41 }
 0x1a7   :  { %1226 = vmatmul.mubr.bf16.gmra.mrb[52].mxu0 %v632_v40 }
 0x24a   :  { %v1167_v46 = vpop.f32.mrb[28].mxu0 }
 0x24b   :  { %v1964_v21 = vadd.f32 %v1167_v46, %v2517_v8  ;;  %v1169_v23 = vpop.f32.mrb[29].mxu0 }
 0x24c   :  { %v1965_v42 = vadd.f32 %v1169_v23, %v2521_v44  ;;  %v1171_v43 = vpop.f32.mrb[30].mxu0  ;;  %v2205_v23 = vld [vmem:[%s2697_s7 + $0x30] sm:$0xff]  }
 0x24d   :  { %v1966_v45 = vadd.f32 %v1171_v43, %v2517_v8  ;;  %v1173_v47 = vpop.f32.mrb[31].mxu0  ;;  %v1236_v49 = vmax.f32 %v1964_v21, 0.0 }
 0x24e   :  { %v1967_v48 = vadd.f32 %v1173_v47, %v2521_v44  ;;  %v1237_v12 = vmax.f32 %v1965_v42, 0.0 }
 0x24f   :  { %v1238_v50 = vmax.f32 %v1966_v45, 0.0 }
 0x250   :  { %v1239_v51 = vmax.f32 %v1967_v48, 0.0 }
 0x251   :  { %v1264_v52 = vpack.c.bf16 %v1238_v50, %v1236_v49 }
 0x252   :  { %v1265_v11 = vpack.c.bf16 %v1239_v51, %v1237_v12  ;;  %v1177_v13 = vpop.f32.mrb[32].mxu0 }
 0x253   :  { %v1968_v54 = vadd.f32 %v1177_v13, %v2517_v8  ;;  %v1179_v55 = vpop.f32.mrb[33].mxu0 }
 0x254   :  { %v1969_v57 = vadd.f32 %v1179_v55, %v2521_v44  ;;  %v1181_v58 = vpop.f32.mrb[34].mxu0  ;;  %1445 = vmatprep.mubr.bf16.mxu1 %v1265_v11 }
 0x255   :  { %v1970_v60 = vadd.f32 %v1181_v58, %v2517_v8  ;;  %v1183_v61 = vpop.f32.mrb[35].mxu0  ;;  %1446 = vmatmul.mubr.bf16.vlgmr.msra.gmra.mrb[28].mxu1 %v1264_v52  ;;  %v1240_v63 = vmax.f32 %v1968_v54, 0.0 }
 0x256   :  { %v1971_v17 = vadd.f32 %v1183_v61, %v2521_v44  ;;  %1921 = vmatpush3.bf16.msra.mxu1 %v2199_v53  ;;  %v1241_v2 = vmax.f32 %v1969_v57, 0.0 }
 0x257   :  { %v1242_v1 = vmax.f32 %v1970_v60, 0.0  ;;  %1922 = vmatprep.subr.bf16.mxu1 %v2287_v35 }
 0x258   :  { %v1243_v3 = vmax.f32 %v1971_v17, 0.0 }
 0x259   :  { %v1266_v18 = vpack.c.bf16 %v1242_v1, %v1240_v63 }
 0x25a   :  { %v1267_v4 = vpack.c.bf16 %v1243_v3, %v1241_v2  ;;  %v1187_v5 = vpop.f32.mrb[36].mxu0  ;;  %1923 = vmatpush3.bf16.msra.mxu1 %v2200_v62 }
 0x25b   :  { %v1972_v9 = vadd.f32 %v1187_v5, %v2517_v8  ;;  %v1189_v10 = vpop.f32.mrb[37].mxu0  ;;  %1924 = vmatprep.subr.bf16.mxu1 %v2287_v35 }
 0x25c   :  { %v1973_v0 = vadd.f32 %v1189_v10, %v2521_v44  ;;  %v1191_v14 = vpop.f32.mrb[38].mxu0  ;;  %1453 = vmatprep.mubr.bf16.mxu1 %v1267_v4 }
 0x25d   :  { %v1974_v15 = vadd.f32 %v1191_v14, %v2517_v8  ;;  %v1193_v16 = vpop.f32.mrb[39].mxu0  ;;  %1454 = vmatmul.mubr.bf16.gmra.mrb[32].mxu1 %v1266_v18  ;;  %v1244_v22 = vmax.f32 %v1972_v9, 0.0 }
 0x25e   :  { %v1975_v19 = vadd.f32 %v1193_v16, %v2521_v44  ;;  %1925 = vmatpush3.bf16.msra.mxu1 %v2201_v7  ;;  %v1245_v25 = vmax.f32 %v1973_v0, 0.0 }
 0x25f   :  { %v1246_v24 = vmax.f32 %v1974_v15, 0.0  ;;  %1926 = vmatprep.subr.bf16.mxu1 %v2287_v35 }
 0x260   :  { %v1247_v26 = vmax.f32 %v1975_v19, 0.0 }
 0x261   :  { %v1268_v27 = vpack.c.bf16 %v1246_v24, %v1244_v22 }
 0x262   :  { %v1269_v28 = vpack.c.bf16 %v1247_v26, %v1245_v25  ;;  %v1197_v29 = vpop.f32.mrb[40].mxu0  ;;  %1927 = vmatpush3.bf16.msra.mxu1 %v2202_v20 }
 0x263   :  { %v1976_v31 = vadd.f32 %v1197_v29, %v2517_v8  ;;  %v1199_v37 = vpop.f32.mrb[41].mxu0  ;;  %1928 = vmatprep.subr.bf16.mxu1 %v2287_v35 }
 0x264   :  { %v1977_v32 = vadd.f32 %v1199_v37, %v2521_v44  ;;  %v1201_v33 = vpop.f32.mrb[42].mxu0  ;;  %1461 = vmatprep.mubr.bf16.mxu1 %v1269_v28 }
 0x265   :  { %v1978_v34 = vadd.f32 %v1201_v33, %v2517_v8  ;;  %v1203_v36 = vpop.f32.mrb[43].mxu0  ;;  %1462 = vmatmul.mubr.bf16.gmra.mrb[36].mxu1 %v1268_v27  ;;  %v1248_v40 = vmax.f32 %v1976_v31, 0.0  ;;  %v2206_v27 = vld [vmem:[%s2697_s7 + $0x38] sm:$0xff]  }
 0x266   :  { %v1979_v38 = vadd.f32 %v1203_v36, %v2521_v44  ;;  %1929 = vmatpush3.bf16.msra.mxu1 %v2203_v30  ;;  %v1249_v56 = vmax.f32 %v1977_v32, 0.0 }
 0x267   :  { %v1250_v41 = vmax.f32 %v1978_v34, 0.0  ;;  %1930 = vmatprep.subr.bf16.mxu1 %v2287_v35 }
 0x268   :  { %v1251_v59 = vmax.f32 %v1979_v38, 0.0 }
 0x269   :  { %v1270_v6 = vpack.c.bf16 %v1250_v41, %v1248_v40 }
 0x26a   :  { %v1271_v46 = vpack.c.bf16 %v1251_v59, %v1249_v56  ;;  %v1207_v21 = vpop.f32.mrb[44].mxu0  ;;  %1931 = vmatpush3.bf16.msra.mxu1 %v2204_v39 }
 0x26b   :  { %v1980_v42 = vadd.f32 %v1207_v21, %v2517_v8  ;;  %v1209_v43 = vpop.f32.mrb[45].mxu0  ;;  %1932 = vmatprep.subr.bf16.mxu1 %v2287_v35 }
 0x26c   :  { %v1981_v45 = vadd.f32 %v1209_v43, %v2521_v44  ;;  %v1211_v47 = vpop.f32.mrb[46].mxu0  ;;  %1469 = vmatprep.mubr.bf16.mxu1 %v1271_v46 }
 0x26d   :  { %v1982_v48 = vadd.f32 %v1211_v47, %v2517_v8  ;;  %v1213_v49 = vpop.f32.mrb[47].mxu0  ;;  %1470 = vmatmul.mubr.bf16.gmra.mrb[40].mxu1 %v1270_v6  ;;  %v1252_v12 = vmax.f32 %v1980_v42, 0.0 }
 0x26e   :  { %v1983_v50 = vadd.f32 %v1213_v49, %v2521_v44  ;;  %1933 = vmatpush3.bf16.msra.mxu1 %v2205_v23  ;;  %v1253_v52 = vmax.f32 %v1981_v45, 0.0 }
 0x26f   :  { %v1254_v51 = vmax.f32 %v1982_v48, 0.0  ;;  %1934 = vmatprep.subr.bf16.mxu1 %v2287_v35 }
 0x270   :  { %v1255_v11 = vmax.f32 %v1983_v50, 0.0 }
 0x271   :  { %v1272_v13 = vpack.c.bf16 %v1254_v51, %v1252_v12 }
 0x272   :  { %v1273_v53 = vpack.c.bf16 %v1255_v11, %v1253_v52  ;;  %v1217_v54 = vpop.f32.mrb[48].mxu0  ;;  %1935 = vmatpush3.bf16.msra.mxu1 %v2206_v27 }
 0x273   :  { %v1984_v55 = vadd.f32 %v1217_v54, %v2517_v8  ;;  %v1219_v57 = vpop.f32.mrb[49].mxu0 }
 0x274   :  { %v1985_v58 = vadd.f32 %v1219_v57, %v2521_v44  ;;  %v1221_v60 = vpop.f32.mrb[50].mxu0  ;;  %1477 = vmatprep.mubr.bf16.mxu1 %v1273_v53 }
 0x275   :  { %v1986_v61 = vadd.f32 %v1221_v60, %v2517_v8  ;;  %v1223_v17 = vpop.f32.mrb[51].mxu0  ;;  %1478 = vmatmul.mubr.bf16.gmra.mrb[44].mxu1 %v1272_v13  ;;  %v1256_v63 = vmax.f32 %v1984_v55, 0.0 }
 0x276   :  { %v1987_v62 = vadd.f32 %v1223_v17, %v2521_v44  ;;  %v1257_v2 = vmax.f32 %v1985_v58, 0.0 }
 0x277   :  { %v1258_v1 = vmax.f32 %v1986_v61, 0.0 }
 0x278   :  { %v1259_v3 = vmax.f32 %v1987_v62, 0.0 }
 0x279   :  { %v1274_v18 = vpack.c.bf16 %v1258_v1, %v1256_v63 }
 0x27a   :  { %v1275_v4 = vpack.c.bf16 %v1259_v3, %v1257_v2  ;;  %v1227_v5 = vpop.f32.mrb[52].mxu0 }
 0x27b   :  { %v1988_v7 = vadd.f32 %v1227_v5, %v2517_v8  ;;  %v1229_v9 = vpop.f32.mrb[53].mxu0 }
 0x27c   :  { %v1989_v10 = vadd.f32 %v1229_v9, %v2521_v44  ;;  %v1231_v0 = vpop.f32.mrb[54].mxu0  ;;  %1485 = vmatprep.mubr.bf16.mxu1 %v1275_v4 }
 0x27d   :  { %v1990_v14 = vadd.f32 %v1231_v0, %v2517_v8  ;;  %v1233_v15 = vpop.f32.mrb[55].mxu0  ;;  %1486 = vmatmul.mubr.bf16.gmra.mrb[48].mxu1 %v1274_v18  ;;  %v1260_v19 = vmax.f32 %v1988_v7, 0.0 }
 0x27e   :  { %v1991_v16 = vadd.f32 %v1233_v15, %v2521_v44  ;;  %v1261_v22 = vmax.f32 %v1989_v10, 0.0  ;;  %v2587_v44 = vld [vmem:[%s2696_s6] ss:$0 sm:$0xff] }
 0x27f   :  { %v1262_v20 = vmax.f32 %v1990_v14, 0.0 }
 0x280   :  { %v1263_v24 = vmax.f32 %v1991_v16, 0.0 }
 0x281   :  { %v1276_v25 = vpack.c.bf16 %v1262_v20, %v1260_v19 }
 0x282   :  { %v1277_v26 = vpack.c.bf16 %v1263_v24, %v1261_v22 }
 0x284   :  { %1493 = vmatprep.mubr.bf16.mxu1 %v1277_v26 }
 0x285   :  { %1494 = vmatmul.mubr.bf16.gmra.mrb[52].mxu1 %v1276_v25 }
 0x286   :  { %1936 = vmatprep.mubr.msk.bf16.mxu1 %vm2288_vm0, %v2287_v35 }
 0x328   :  { %v1863_v8 = vpop.f32.mrb[28].mxu1 }
 0x329   :  { %v1864_v28 = vpop.f32.mrb[29].mxu1 }
 0x32a   :  { %v1865_v29 = vadd.f32 %v1864_v28, %v1863_v8  ;;  %v1866_v30 = vpop.f32.mrb[30].mxu1 }
 0x32b   :  { %v1867_v31 = vpop.f32.mrb[31].mxu1 }
 0x32c   :  { %v1448_v37 = vadd.f32 %v1865_v29, %v2587_v44  ;;  %v1868_v32 = vadd.f32 %v1867_v31, %v1866_v30 }
 0x32e   :  { %v1451_v33 = vadd.f32 %v1868_v32, %v2587_v44  ;;  %v1502_v34 = vmax.f32 %v1448_v37, 0.0 }
 0x330   :  { %v1503_v36 = vmax.f32 %v1451_v33, 0.0  ;;  %v1869_v38 = vpop.f32.mrb[32].mxu1 }
 0x331   :  { %v1870_v39 = vpop.f32.mrb[33].mxu1 }
 0x332   :  { %v1516_v40 = vpack.c.bf16 %v1503_v36, %v1502_v34  ;;  %v1871_v41 = vadd.f32 %v1870_v39, %v1869_v38  ;;  %v1872_v56 = vpop.f32.mrb[34].mxu1 }
 0x333   :  { %v1873_v59 = vpop.f32.mrb[35].mxu1 }
 0x334   :  { %v1456_v6 = vadd.f32 %v1871_v41, %v2587_v44  ;;  %v1874_v46 = vadd.f32 %v1873_v59, %v1872_v56  ;;  %1937 = vmatmul.mubr.bf16.vlgmr.msra.gmra.mrb[56].mxu1 %v1516_v40  ;;  %v2618_v59 = vld [vmem:[%s2698_s8] ss:$0 sm:$0xff] }
 0x335   :  { %1940 = vmatprep.mubr.msk.bf16.mxu1 %vm2288_vm0, %v2287_v35 }
 0x336   :  { %v1459_v21 = vadd.f32 %v1874_v46, %v2587_v44  ;;  %v1504_v23 = vmax.f32 %v1456_v6, 0.0 }
 0x338   :  { %v1505_v42 = vmax.f32 %v1459_v21, 0.0  ;;  %v1875_v43 = vpop.f32.mrb[36].mxu1 }
 0x339   :  { %v1876_v45 = vpop.f32.mrb[37].mxu1 }
 0x33a   :  { %v1877_v47 = vadd.f32 %v1876_v45, %v1875_v43  ;;  %v1878_v48 = vpop.f32.mrb[38].mxu1  ;;  %v1517_v49 = vpack.c.bf16 %v1505_v42, %v1504_v23 }
 0x33b   :  { %v1879_v50 = vpop.f32.mrb[39].mxu1 }
 0x33c   :  { %v1464_v12 = vadd.f32 %v1877_v47, %v2587_v44  ;;  %v1880_v51 = vadd.f32 %v1879_v50, %v1878_v48  ;;  %1941 = vmatmul.mubr.bf16.gmra.mrb[60].mxu1 %v1517_v49 }
 0x33d   :  { %1944 = vmatprep.mubr.msk.bf16.mxu1 %vm2288_vm0, %v2287_v35 }
 0x33e   :  { %v1467_v52 = vadd.f32 %v1880_v51, %v2587_v44  ;;  %v1506_v11 = vmax.f32 %v1464_v12, 0.0 }
 0x340   :  { %v1507_v13 = vmax.f32 %v1467_v52, 0.0  ;;  %v1881_v53 = vpop.f32.mrb[40].mxu1 }
 0x341   :  { %v1882_v54 = vpop.f32.mrb[41].mxu1 }
 0x342   :  { %v1883_v55 = vadd.f32 %v1882_v54, %v1881_v53  ;;  %v1884_v57 = vpop.f32.mrb[42].mxu1  ;;  %v1518_v58 = vpack.c.bf16 %v1507_v13, %v1506_v11 }
 0x343   :  { %v1885_v60 = vpop.f32.mrb[43].mxu1 }
 0x344   :  { %v1472_v61 = vadd.f32 %v1883_v55, %v2587_v44  ;;  %v1886_v17 = vadd.f32 %v1885_v60, %v1884_v57  ;;  %1945 = vmatmul.mubr.bf16.gmra.mrb[64].mxu1 %v1518_v58 }
 0x345   :  { %1948 = vmatprep.mubr.msk.bf16.mxu1 %vm2288_vm0, %v2287_v35 }
 0x346   :  { %v1475_v62 = vadd.f32 %v1886_v17, %v2587_v44  ;;  %v1508_v63 = vmax.f32 %v1472_v61, 0.0 }
 0x348   :  { %v1509_v1 = vmax.f32 %v1475_v62, 0.0  ;;  %v1887_v2 = vpop.f32.mrb[44].mxu1 }
 0x349   :  { %v1888_v3 = vpop.f32.mrb[45].mxu1 }
 0x34a   :  { %v1889_v18 = vadd.f32 %v1888_v3, %v1887_v2  ;;  %v1890_v4 = vpop.f32.mrb[46].mxu1  ;;  %v1519_v5 = vpack.c.bf16 %v1509_v1, %v1508_v63 }
 0x34b   :  { %v1891_v7 = vpop.f32.mrb[47].mxu1 }
 0x34c   :  { %v1480_v9 = vadd.f32 %v1889_v18, %v2587_v44  ;;  %v1892_v10 = vadd.f32 %v1891_v7, %v1890_v4  ;;  %1949 = vmatmul.mubr.bf16.gmra.mrb[68].mxu1 %v1519_v5 }
 0x34d   :  { %1952 = vmatprep.mubr.msk.bf16.mxu1 %vm2288_vm0, %v2287_v35 }
 0x34e   :  { %v1483_v0 = vadd.f32 %v1892_v10, %v2587_v44  ;;  %v1510_v14 = vmax.f32 %v1480_v9, 0.0 }
 0x350   :  { %v1511_v15 = vmax.f32 %v1483_v0, 0.0  ;;  %v1893_v16 = vpop.f32.mrb[48].mxu1 }
 0x351   :  { %v1894_v19 = vpop.f32.mrb[49].mxu1 }
 0x352   :  { %v1895_v20 = vadd.f32 %v1894_v19, %v1893_v16  ;;  %v1896_v22 = vpop.f32.mrb[50].mxu1  ;;  %v1520_v24 = vpack.c.bf16 %v1511_v15, %v1510_v14 }
 0x353   :  { %v1897_v25 = vpop.f32.mrb[51].mxu1 }
 0x354   :  { %v1488_v26 = vadd.f32 %v1895_v20, %v2587_v44  ;;  %v1898_v27 = vadd.f32 %v1897_v25, %v1896_v22  ;;  %1953 = vmatmul.mubr.bf16.gmra.mrb[72].mxu1 %v1520_v24 }
 0x355   :  { %1956 = vmatprep.mubr.msk.bf16.mxu1 %vm2288_vm0, %v2287_v35 }
 0x356   :  { %v1491_v8 = vadd.f32 %v1898_v27, %v2587_v44  ;;  %v1512_v28 = vmax.f32 %v1488_v26, 0.0 }
 0x358   :  { %v1513_v29 = vmax.f32 %v1491_v8, 0.0  ;;  %v1899_v30 = vpop.f32.mrb[52].mxu1 }
 0x359   :  { %v1900_v31 = vpop.f32.mrb[53].mxu1 }
 0x35a   :  { %v1901_v37 = vadd.f32 %v1900_v31, %v1899_v30  ;;  %v1902_v32 = vpop.f32.mrb[54].mxu1  ;;  %v1521_v33 = vpack.c.bf16 %v1513_v29, %v1512_v28 }
 0x35b   :  { %v1903_v34 = vpop.f32.mrb[55].mxu1 }
 0x35c   :  { %v1496_v36 = vadd.f32 %v1901_v37, %v2587_v44  ;;  %v1904_v38 = vadd.f32 %v1903_v34, %v1902_v32  ;;  %1957 = vmatmul.mubr.bf16.gmra.mrb[76].mxu1 %v1521_v33 }
 0x35d   :  { %1960 = vmatprep.mubr.msk.bf16.mxu1 %vm2288_vm0, %v2287_v35 }
 0x35e   :  { %v1499_v39 = vadd.f32 %v1904_v38, %v2587_v44  ;;  %v1514_v40 = vmax.f32 %v1496_v36, 0.0 }
 0x360   :  { %v1515_v41 = vmax.f32 %v1499_v39, 0.0 }
 0x362   :  { %v1522_v56 = vpack.c.bf16 %v1515_v41, %v1514_v40 }
 0x364   :  { %1961 = vmatmul.mubr.bf16.gmra.mrb[80].mxu1 %v1522_v56 }
 0x407   :  { %v1628_v6 = vpop.f32.mrb[56].mxu1 }
 0x408   :  { %v1629_v46 = vadd.f32 %v2618_v59, %v1628_v6  ;;  %v1938_v21 = vpop.f32.mrb[57].mxu1 }
 0x409   :  { %v1631_v23 = vpop.f32.mrb[58].mxu1 }
 0x40a   :  { %v1683_v42 = vmax.f32 %v1629_v46, 0.0  ;;  %v1632_v35 = vadd.f32 %v2618_v59, %v1631_v23  ;;  %v1939_v43 = vpop.f32.mrb[59].mxu1 }
 0x40c   :  { %1698 = vst.msk [vmem:[%s2699_s9] sm:$0xff] %vm1697_vm1, %v1683_v42  ;;  %v1684_v44 = vmax.f32 %v1632_v35, 0.0 }
 0x40e   :  { %1699 = vst.msk [vmem:[%s2699_s9 + $0x8] sm:$0xff] %vm1697_vm1, %v1684_v44 }
 0x40f   :  { %v1636_v45 = vpop.f32.mrb[60].mxu1 }
 0x410   :  { %v1637_v47 = vadd.f32 %v2618_v59, %v1636_v45  ;;  %v1942_v48 = vpop.f32.mrb[61].mxu1 }
 0x411   :  { %v1639_v49 = vpop.f32.mrb[62].mxu1 }
 0x412   :  { %v1685_v50 = vmax.f32 %v1637_v47, 0.0  ;;  %v1640_v12 = vadd.f32 %v2618_v59, %v1639_v49  ;;  %v1943_v51 = vpop.f32.mrb[63].mxu1 }
 0x414   :  { %1700 = vst.msk [vmem:[%s2699_s9 + $0x10] sm:$0xff] %vm1697_vm1, %v1685_v50  ;;  %v1686_v52 = vmax.f32 %v1640_v12, 0.0 }
 0x416   :  { %1701 = vst.msk [vmem:[%s2699_s9 + $0x18] sm:$0xff] %vm1697_vm1, %v1686_v52 }
 0x417   :  { %v1644_v11 = vpop.f32.mrb[64].mxu1 }
 0x418   :  { %v1645_v13 = vadd.f32 %v2618_v59, %v1644_v11  ;;  %v1946_v53 = vpop.f32.mrb[65].mxu1 }
 0x419   :  { %v1647_v54 = vpop.f32.mrb[66].mxu1 }
 0x41a   :  { %v1687_v55 = vmax.f32 %v1645_v13, 0.0  ;;  %v1648_v57 = vadd.f32 %v2618_v59, %v1647_v54  ;;  %v1947_v58 = vpop.f32.mrb[67].mxu1 }
 0x41c   :  { %1702 = vst.msk [vmem:[%s2699_s9 + $0x20] sm:$0xff] %vm1697_vm1, %v1687_v55  ;;  %v1688_v60 = vmax.f32 %v1648_v57, 0.0 }
 0x41e   :  { %1703 = vst.msk [vmem:[%s2699_s9 + $0x28] sm:$0xff] %vm1697_vm1, %v1688_v60 }
 0x41f   :  { %v1652_v61 = vpop.f32.mrb[68].mxu1 }
 0x420   :  { %v1653_v17 = vadd.f32 %v2618_v59, %v1652_v61  ;;  %v1950_v62 = vpop.f32.mrb[69].mxu1 }
 0x421   :  { %v1655_v63 = vpop.f32.mrb[70].mxu1 }
 0x422   :  { %v1689_v1 = vmax.f32 %v1653_v17, 0.0  ;;  %v1656_v2 = vadd.f32 %v2618_v59, %v1655_v63  ;;  %v1951_v3 = vpop.f32.mrb[71].mxu1 }
 0x424   :  { %1704 = vst.msk [vmem:[%s2699_s9 + $0x30] sm:$0xff] %vm1697_vm1, %v1689_v1  ;;  %v1690_v18 = vmax.f32 %v1656_v2, 0.0 }
 0x426   :  { %1705 = vst.msk [vmem:[%s2699_s9 + $0x38] sm:$0xff] %vm1697_vm1, %v1690_v18 }
 0x427   :  { %v1660_v4 = vpop.f32.mrb[72].mxu1 }
 0x428   :  { %v1661_v5 = vadd.f32 %v2618_v59, %v1660_v4  ;;  %v1954_v7 = vpop.f32.mrb[73].mxu1 }
 0x429   :  { %v1663_v9 = vpop.f32.mrb[74].mxu1 }
 0x42a   :  { %v1691_v10 = vmax.f32 %v1661_v5, 0.0  ;;  %v1664_v0 = vadd.f32 %v2618_v59, %v1663_v9  ;;  %v1955_v14 = vpop.f32.mrb[75].mxu1 }
 0x42c   :  { %1706 = vst.msk [vmem:[%s2699_s9 + $0x40] sm:$0xff] %vm1697_vm1, %v1691_v10  ;;  %v1692_v15 = vmax.f32 %v1664_v0, 0.0 }
 0x42e   :  { %1707 = vst.msk [vmem:[%s2699_s9 + $0x48] sm:$0xff] %vm1697_vm1, %v1692_v15 }
 0x42f   :  { %v1668_v16 = vpop.f32.mrb[76].mxu1 }
 0x430   :  { %v1669_v19 = vadd.f32 %v2618_v59, %v1668_v16  ;;  %v1958_v20 = vpop.f32.mrb[77].mxu1 }
 0x431   :  { %v1671_v22 = vpop.f32.mrb[78].mxu1 }
 0x432   :  { %v1693_v24 = vmax.f32 %v1669_v19, 0.0  ;;  %v1672_v25 = vadd.f32 %v2618_v59, %v1671_v22  ;;  %v1959_v26 = vpop.f32.mrb[79].mxu1 }
 0x434   :  { %1708 = vst.msk [vmem:[%s2699_s9 + $0x50] sm:$0xff] %vm1697_vm1, %v1693_v24  ;;  %v1694_v27 = vmax.f32 %v1672_v25, 0.0 }
 0x436   :  { %1709 = vst.msk [vmem:[%s2699_s9 + $0x58] sm:$0xff] %vm1697_vm1, %v1694_v27 }
 0x437   :  { %v1676_v8 = vpop.f32.mrb[80].mxu1 }
 0x438   :  { %v1677_v28 = vadd.f32 %v2618_v59, %v1676_v8  ;;  %v1962_v29 = vpop.f32.mrb[81].mxu1 }
 0x439   :  { %v1679_v30 = vpop.f32.mrb[82].mxu1 }
 0x43a   :  { %v1695_v31 = vmax.f32 %v1677_v28, 0.0  ;;  %v1680_v37 = vadd.f32 %v2618_v59, %v1679_v30  ;;  %v1963_v32 = vpop.f32.mrb[83].mxu1 }
 0x43c   :  { %1710 = vst.msk [vmem:[%s2699_s9 + $0x60] sm:$0xff] %vm1697_vm1, %v1695_v31  ;;  %v1696_v33 = vmax.f32 %v1680_v37, 0.0 }
 0x43e   :  { %1711 = vst.msk [vmem:[%s2699_s9 + $0x68] sm:$0xff] %vm1697_vm1, %v1696_v33 }
 0x43f   :  { %1716 = vsyncpa [#allocation3], 1 }
 0x440   :  { %1717 = vsyncpa [#allocation5], 1 }

</bundles_post_ra>
